<compile_context>
chip_gen: v6e
topology: v6e:2x2x1
jax: 0.10.0
libtpu: 0.0.40
codegen_flags: <defaults>
</compile_context>

<pallas_src>
import math

import jax
import jax.numpy as jnp
from jax.experimental import pallas as pl
from jax.experimental.pallas import tpu as pltpu


def _ffm_kernel(bT_ref, x_ref, o_ref):
    # bT_ref: (M, C) = (2*pi*B)^T   (tiny, resident across the whole grid)
    # x_ref : (C, thw)   tile of one image's (C, H*W) slab
    # o_ref : (2*M, thw) output tile; rows [0,M) = sin, rows [M,2M) = cos
    m = bT_ref.shape[0]
    proj = jnp.dot(bT_ref[...], x_ref[...], preferred_element_type=jnp.float32)
    # Full-lane-width sublane-range stores (unmasked vst when M % 8 == 0).
    o_ref[:m, :] = jnp.sin(proj).astype(o_ref.dtype)
    o_ref[m:, :] = jnp.cos(proj).astype(o_ref.dtype)


def fourier_feature_mapping(x, B, *, tile_hw=8192, out_dtype=None):
    """x: (N, C, H, W), B: (C, M) -> (N, 2*M, H, W)."""
    N, C, H, W = x.shape
    M = B.shape[1]
    HW = H * W
    out_dtype = x.dtype if out_dtype is None else jnp.dtype(out_dtype)
    out_bytes = jnp.dtype(out_dtype).itemsize

    # Free view: NCHW row-major is already (N, C, H*W). No permutes anywhere.
    x3 = x.reshape(N, C, HW)
    bT = (2.0 * math.pi) * B.T.astype(jnp.float32)   # fold 2*pi once; keep f32.

    # --- VMEM budgeting (generation-aware safe on v5e/v6e/v7x) ---------------
    # Double-buffered BlockSpec buffers per spatial lane:
    #   output: 2 * (2M * out_bytes), input: 2 * (C * 4 bytes)
    per_lane = 2 * (2 * M * out_bytes + C * 4)
    buffer_budget = 16 * 1024 * 1024      # BlockSpec buffers; scratch headroom
    cap = max(128, (buffer_budget // per_lane) // 128 * 128)
    tile_hw = max(128, (min(tile_hw, cap) // 128) * 128)

    # --- Spatial tile selection (avoid pad + post-slice HBM round trips) -----
    padded = False
    if HW <= tile_hw:
        thw = HW                 # full extent: no 128-multiple constraint
        n_hw = 1
        # v7x megacore: ensure >= 2 grid steps so both TensorCores get work.
        if N == 1 and HW % 256 == 0:
            thw = HW // 2
            n_hw = 2
    else:
        # Largest multiple-of-128 divisor of HW that fits the tile budget.
        thw = 0
        d = tile_hw
        while d >= 128:
            if HW % d == 0:
                thw = d
                break
            d -= 128
        if thw == 0:
            # TODO(synk): ragged HW with no multiple-of-128 divisor — fall back
            # to pad + slice (costs an extra HBM pass) instead of in-kernel
            # tail masking.
            thw = tile_hw
            padded = True
        n_hw = pl.cdiv(HW, thw)

    hw_pad = n_hw * thw
    if padded and hw_pad != HW:
        x3 = jnp.pad(x3, ((0, 0), (0, 0), (0, hw_pad - HW)))

    grid = (N, n_hw)

    cost = pl.CostEstimate(
        flops=2 * M * C * N * HW,
        transcendentals=2 * M * N * HW,
        bytes_accessed=4 * C * N * HW + out_bytes * 2 * M * N * HW,
    )

    out3 = pl.pallas_call(
        _ffm_kernel,
        out_shape=jax.ShapeDtypeStruct((N, 2 * M, hw_pad), out_dtype),
        grid_spec=pltpu.PrefetchScalarGridSpec(
            num_scalar_prefetch=0,
            grid=grid,
            in_specs=[
                # (2*pi*B)^T is tiny and resident across the whole grid.
                pl.BlockSpec((M, C), lambda n, h: (0, 0)),
                # One image's (C, thw) spatial tile; leading N dim squeezed.
                pl.BlockSpec((None, C, thw), lambda n, h: (n, 0, h)),
            ],
            out_specs=pl.BlockSpec((None, 2 * M, thw), lambda n, h: (n, 0, h)),
        ),
        compiler_params=pltpu.CompilerParams(
            dimension_semantics=("parallel", "parallel"),
            vmem_limit_bytes=28 * 1024 * 1024,
        ),
        cost_estimate=cost,
    )(bT, x3)

    if hw_pad != HW:
        out3 = out3[:, :, :HW]
    # Free reshape: (N, 2M, H*W) -> (N, 2M, H, W). No transpose needed.
    return out3.reshape(N, 2 * M, H, W)


def _reference(x, B):
    N, C, H, W = x.shape
    x_flat = jnp.transpose(x, (0, 2, 3, 1)).reshape(-1, C)
    proj = 2.0 * math.pi * (x_flat @ B)
    mapped = jnp.concatenate([jnp.sin(proj), jnp.cos(proj)], axis=-1)
    return jnp.transpose(mapped.reshape(N, H, W, -1), (0, 3, 1, 2))


if __name__ == "__main__":
    key = jax.random.PRNGKey(0)
    k_x, k_b = jax.random.split(key)

    N, C, H, W = 2, 4, 16, 16
    mapping_size = 64
    scale = 10.0

    x = jax.random.normal(k_x, (N, C, H, W), dtype=jnp.float32)
    # Deterministic stand-in for nn.Parameter(torch.randn(in_dim, mapping_size)*scale)
    B = jax.random.normal(k_b, (C, mapping_size), dtype=jnp.float32) * scale

    out = jax.block_until_ready(fourier_feature_mapping(x, B))
    ref = _reference(x, B)

    assert out.shape == (N, 2 * mapping_size, H, W), out.shape
    assert jnp.allclose(out, ref, atol=1e-3, rtol=1e-3), "mismatch vs JAX reference"

    print("KERNEL_OK")
</pallas_src>

<mosaic_0001>
module attributes {stable_mosaic.version = 11 : i64} {
  func.func @_ffm_kernel(%arg0: i32, %arg1: i32, %arg2: memref<64x4xf32, #tpu.memory_space<vmem>>, %arg3: memref<1x4x256xf32, #tpu.memory_space<vmem>>, %arg4: memref<1x128x256xf32, #tpu.memory_space<vmem>>) attributes {dimension_semantics = [#tpu.dimension_semantics<parallel>, #tpu.dimension_semantics<parallel>], iteration_bounds = array<i64: 2, 1>, scalar_prefetch = 0 : i64, scratch_operands = 0 : i64, tpu.core_type = #tpu.core_type<tc>, window_params = [{pipeline_mode = #tpu.pipeline_mode<synchronous>, transform_indices = @transform_0, window_bounds = array<i64: 64, 4>}, {transform_indices = @transform_1, window_bounds = array<i64: 1, 4, 256>}, {transform_indices = @transform_2, window_bounds = array<i64: 1, 128, 256>}]} {
    %c0 = arith.constant 0 : index
    %c0_0 = arith.constant 0 : index
    %0 = vector.load %arg2[%c0, %c0_0] : memref<64x4xf32, #tpu.memory_space<vmem>>, vector<64x4xf32>
    %c0_1 = arith.constant 0 : index
    %c0_2 = arith.constant 0 : index
    %c0_3 = arith.constant 0 : index
    %1 = vector.load %arg3[%c0_1, %c0_2, %c0_3] : memref<1x4x256xf32, #tpu.memory_space<vmem>>, vector<1x4x256xf32>
    %2 = vector.shape_cast %1 : vector<1x4x256xf32> to vector<4x256xf32>
    %cst = arith.constant dense<0.000000e+00> : vector<64x256xf32>
    %3 = tpu.matmul %0, %2, %cst {dimension_numbers = #tpu.dot_dimension_numbers<[1], [0], [0], [1], [0, 0, 1, 1], [], []>} : vector<64x4xf32>, vector<4x256xf32>, vector<64x256xf32> -> vector<64x256xf32>
    %4 = math.sin %3 : vector<64x256xf32>
    %c0_4 = arith.constant 0 : index
    %c0_5 = arith.constant 0 : index
    %c0_6 = arith.constant 0 : index
    %5 = vector.load %arg4[%c0_4, %c0_5, %c0_6] : memref<1x128x256xf32, #tpu.memory_space<vmem>>, vector<1x64x256xf32>
    %6 = vector.shape_cast %5 : vector<1x64x256xf32> to vector<64x256xf32>
    %7 = vector.shape_cast %4 : vector<64x256xf32> to vector<1x64x256xf32>
    tpu.vector_store %arg4[%c0_4, %c0_5, %c0_6], %7 {strides = array<i32>} : memref<1x128x256xf32, #tpu.memory_space<vmem>>, vector<1x64x256xf32>,
    %8 = math.cos %3 : vector<64x256xf32>
    %c0_7 = arith.constant 0 : index
    %c64 = arith.constant 64 : index
    %c0_8 = arith.constant 0 : index
    %9 = vector.load %arg4[%c0_7, %c64, %c0_8] : memref<1x128x256xf32, #tpu.memory_space<vmem>>, vector<1x64x256xf32>
    %10 = vector.shape_cast %9 : vector<1x64x256xf32> to vector<64x256xf32>
    %11 = vector.shape_cast %8 : vector<64x256xf32> to vector<1x64x256xf32>
    tpu.vector_store %arg4[%c0_7, %c64, %c0_8], %11 {strides = array<i32>} : memref<1x128x256xf32, #tpu.memory_space<vmem>>, vector<1x64x256xf32>,
    return
  }
  func.func @transform_0(%arg0: i32, %arg1: i32) -> (i32, i32) {
    %c0_i32 = arith.constant 0 : i32
    %c0_i32_0 = arith.constant 0 : i32
    %c0_i32_1 = arith.constant 0 : i32
    return %c0_i32, %c0_i32_0 : i32, i32
  }
  func.func @transform_1(%arg0: i32, %arg1: i32) -> (i32, i32, i32) {
    %c0_i32 = arith.constant 0 : i32
    %c0_i32_0 = arith.constant 0 : i32
    return %arg0, %c0_i32, %arg1 : i32, i32, i32
  }
  func.func @transform_2(%arg0: i32, %arg1: i32) -> (i32, i32, i32) {
    %c0_i32 = arith.constant 0 : i32
    %c0_i32_0 = arith.constant 0 : i32
    return %arg0, %c0_i32, %arg1 : i32, i32, i32
  }
}

</mosaic_0001>

<bundles_post_ra>
// kernel: tpu_custom_call.1
= control target key start
LH: loop header
LB: loop body
LE: loop exit
PB: predicated region body
PF: predicated region fallthrough
CT: control target
= control target key end

     0   :  { %7 = vsyncpa [#allocation3], 0  ;;  %s5815_s0 = inlined_call_operand.vmem [shape: f32[64,4], index: 0, kind: input, shape index: {}]   ;;  %s5816_s1 = inlined_call_operand.vmem [shape: f32[2,4,256], index: 1, kind: input, shape index: {}]   ;;  %s5817_s2 = inlined_call_operand.hbm [shape: f32[2,128,256], index: 2, kind: output, shape index: {}]  }
   0x1   :  { %9 = vsyncpa [#allocation3 + $0x1], 0  ;;  %s4217_s9 = smov 0   ;;  %s4219_s10 = smov 0  }
   0x2   :  { %s4221_s11 = smov 0   ;;  %s4223_s12 = smov 0  }
   0x3   :  { %s4225_s13 = smov 0   ;;  %s4227_s14 = smov 0  }
   0x4 LB: > { %s3766_s15 = sadd.s32 4294967295, %s4190_s14   ;;  %s3767_s16 = sadd.s32 4294967294, %s4190_s14   ;;  %s4190_s14 = sphi %s4227_s14, %s15_s14   ;;  %s4186_s13 = sphi %s4225_s13, %s5850_s13   ;;  %s4182_s12 = sphi %s4223_s12, %s5849_s12   ;;  %s4178_s11 = sphi %s4221_s11, %s5848_s11   ;;  %s4174_s10 = sphi %s4219_s10, %s5847_s10   ;;  %s4170_s9 = sphi %s4217_s9, %s5846_s9  }
   0x5   : > { %s27_s17 = sadd.s32 1, %s4186_s13  ;;  %s85_s18 = sadd.s32 1, %s4178_s11 }
   0x6   : > { %p29_p0 = scmp.ge.s32.totalorder %s27_s17, 2  ;;  %p95_p1 = scmp.ne.s32.totalorder %s4178_s11, %s4174_s10 }
   0x7   : > { %p96_p2 = scmp.eq.s32.totalorder %s3766_s15, 1  ;;  %p101_p3 = scmp.ne.s32.totalorder %s4174_s10, %s4170_s9 }
   0x8   : > { %s5852_s17 = smov (%p29_p0, %s27_s17), 0  ;;  %p102_p5 = scmp.eq.s32.totalorder %s3767_s16, 1 }
   0x9   : > { %p4257_p4 = por %p96_p2, %p95_p1  ;;  %s80_s20 = ssub.s32 %s4186_s13, %s5852_s17 }
   0xa   : > { %p3770_p6 = scmp.ge.s32.totalorder %s4190_s14, 1  ;;  %p83_p7 = scmp.eq.s32.totalorder %s80_s20, 0 }
   0xb   : > { %p4264_p8 = por %p102_p5, %p101_p3  ;;  %p136_p9 = scmp.lt.s32.totalorder %s4190_s14, 3 }
   0xc   : > { %s4270_s22 = scalar_select %p83_p7, %s4178_s11, %s85_s18  }
   0xd   : > { %p137_p10 = pnand %p3770_p6, %p136_p9 }
   0xe   : > { %p163_p11 = scmp.lt.s32.totalorder (!%p137_p10), %s4182_s12, 1  ;;  %s159_s26 = sand.u32 (!%p137_p10), 1, %s4174_s10  }
   0xf   : > { %140 = sbr.rel (%p137_p10) target bundleno = 694 (0x2b6), region = 28  ;;  %s3918_s29 = sshll.u32 (!%p137_p10), %s4182_s12, 12 }
  0x10   : > { %s5770_s5 = scalar_lea.sflag (!%p137_p10), [#allocation3], %s159_s26  ;;  %s4199_s7 = smov (!%p137_p10), [#allocation2]  }
  0x11   : > { %s4118_s8 = sshll.u32 (!%p137_p10), %s4199_s7, 4  ;;  %s4119_s8 = int_to_ptr.vmem [resolvable:$false] %s4118_s8 }
  0x12   : > { %s4120_s15 = scalar_lea.vmem (!%p137_p10), %s4119_s8, 8192 }
  0x14   : > { %v4192_v0 = vmov 0.0   ;;  %s164_s23 = scalar_select %p163_p11, %s4182_s12, 1  ;;  %vm209_vm0 = vcmask 1043456   ;;  %v173_v3 = vld [vmem:[%s5815_s0] sm:$0xff]  ;;  %vm184_vm1 = vcmask 31744   ;;  %v174_v5 = vld [vmem:[%s5815_s0 + $0x8] sm:$0xff] }
  0x15   : > { %278 = vmatprep.mubr.f32.mxu0 %v4192_v0  ;;  %302 = vmatprep.mubr.f32.mxu1 %v4192_v0  ;;  %v177_v4 = vld [vmem:[%s5815_s0 + $0x20] sm:$0xff]  ;;  %v178_v6 = vld [vmem:[%s5815_s0 + $0x28] sm:$0xff]  ;;  %v175_v7 = vld [vmem:[%s5815_s0 + $0x10] sm:$0xff]  ;;  %v4193_v40 = vmov 683565275   ;;  %s5761_s12 = scalar_lea.hbm %s5817_s2, %s3918_s29 }
  0x16   : > { %s3917_s24 = sshll.u32 %s164_s23, 3  ;;  %v179_v8 = vld [vmem:[%s5815_s0 + $0x30] sm:$0xff]  ;;  %v176_v9 = vld [vmem:[%s5815_s0 + $0x18] sm:$0xff]  ;;  %v4194_v44 = vmov 2475754826  }
  0x17   : > { %s170_s27 = scalar_lea.vmem %s5816_s1, %s3917_s24  ;;  %v180_v10 = vld [vmem:[%s5815_s0 + $0x38] sm:$0xff]  ;;  %v4195_v46 = vmov 2131351028   ;;  %v4196_v48 = vmov 2102212464  }
  0x18   : > { %v181_v1 = vld [vmem:[%s170_s27] sm:$0xff]  ;;  %v4197_v50 = vmov 920167782   ;;  %v4198_v57 = vmov 1326507024   ;;  %s3771_s27 = sshll.u32 %s159_s26, 8 }
  0x19   : > { %v183_v2 = vcombine.high %v181_v1, %v181_v1  ;;  %s4623_s28 = scalar_lea.vmem [#allocation2], %s3771_s27 }
  0x1a   : > { %s3687_s30 = sshll.u32 %s4623_s28, 4  ;;  %s5763_s30 = int_to_ptr.vmem [resolvable:$true] %s3687_s30 }
  0x1b   : > { %3774 = vmatprep.subr.msk.mxu0 %vm209_vm0, %v183_v2  ;;  %3919 = vmatprep.subr.msk.mxu1 %vm209_vm0, %v183_v2  ;;  %s4114_s6 = scalar_lea.vmem %s5763_s30, 4096  ;;  %p4121_p1 = scmp.lt.s32.totalorder %s5763_s30, %s4119_s8 }
  0x1c   : > { %3775 = vmatpush1.msk.msra.mxu0 %vm209_vm0, %v181_v1  ;;  %3920 = vmatpush1.msk.msra.mxu1 %vm209_vm0, %v181_v1  ;;  %p4115_p12 = scmp.ne.s32.totalorder %s5763_s30, %s4114_s6  ;;  %p4122_p2 = scmp.lt.s32.totalorder %s4120_s15, %s4114_s6 }
  0x1d   : > { %3776 = vmatmul.mubr.msk.f32.vlgmr.msra.gmra.mxu0 %vm184_vm1, %v173_v3  ;;  %3780 = vmatmul.mubr.msk.f32.vlgmr.msra.gmra.mxu1 %vm184_vm1, %v177_v4 }
  0x1e   : > { %284 = vmatprep.mubr.f32.mxu0 %v4192_v0  ;;  %308 = vmatprep.mubr.f32.mxu1 %v4192_v0  ;;  %p4116_p13 = pnand %p4115_p12, %p4257_p4  ;;  %p4123_p3 = por %p4122_p2, %p4121_p1 }
  0x20   : > { %p4117_p0 = pneg %p4116_p13 }
  0x21   : > { %3777 = vmatmul.mubr.msk.f32.gmra.mxu0 %vm184_vm1, %v174_v5  ;;  %3781 = vmatmul.mubr.msk.f32.gmra.mxu1 %vm184_vm1, %v178_v6 }
  0x22   : > { %290 = vmatprep.mubr.f32.mxu0 %v4192_v0  ;;  %314 = vmatprep.mubr.f32.mxu1 %v4192_v0  ;;  %p4124_p5 = pnand %p4123_p3, %p4117_p0 }
  0x25   : > { %3778 = vmatmul.mubr.msk.f32.gmra.mxu0 %vm184_vm1, %v175_v7  ;;  %3782 = vmatmul.mubr.msk.f32.gmra.mxu1 %vm184_vm1, %v179_v8 }
  0x26   : > { %296 = vmatprep.mubr.f32.mxu0 %v4192_v0  ;;  %320 = vmatprep.mubr.f32.mxu1 %v4192_v0 }
  0x29   : > { %3779 = vmatmul.mubr.msk.f32.gmra.mxu0 %vm184_vm1, %v176_v9  ;;  %3783 = vmatmul.mubr.msk.f32.gmra.mxu1 %vm184_vm1, %v180_v10 }
  0xdd   : > { %v4309_v11 = vpop.f32.mrf.mxu0  ;;  %v4311_v12 = vpop.f32.mrf.mxu1 }
  0xde   : > { %v327_v13 = vand.u32 2147483647, %v4309_v11  ;;  %v330_v14 = vand.u32 2139095040, %v4309_v11  ;;  %v1159_v15 = vand.u32 2147483647, %v4311_v12  ;;  %v1162_v16 = vand.u32 2139095040, %v4311_v12 }
  0xdf   : > { %v4317_v17 = vpop.f32.mrf.mxu0  ;;  %vm329_vm15 = vcmp.lt.s32.totalorder %v4309_v11, 0 }
  0xe0   : > { %v331_v18 = vshrl.u32 %v330_v14, 23  ;;  %v334_v19 = vand.u32 8388607, %v327_v13  ;;  %v1163_v20 = vshrl.u32 %v1162_v16, 23  ;;  %v1166_v21 = vand.u32 8388607, %v1159_v15 }
  0xe1   : > { %v434_v22 = vand.u32 2139095040, %v4317_v17  ;;  %v431_v37 = vand.u32 2147483647, %v4317_v17 }
  0xe2   : > { %v3784_v23 = vadd.s32 4294967169, %v331_v18  ;;  %v3816_v24 = vadd.s32 4294967169, %v1163_v20  ;;  %v335_v27 = vor.u32 8388608, %v334_v19  ;;  %v1167_v28 = vor.u32 8388608, %v1166_v21 }
  0xe3   : > { %v435_v25 = vshrl.u32 %v434_v22, 23 }
  0xe4   : > { %v337_v26 = vadd.s32 1, %v3784_v23  ;;  %v1169_v29 = vadd.s32 1, %v3816_v24  ;;  %v4324_v35 = vshll.u32 %v335_v27, 8  ;;  %v4326_v36 = vshll.u32 %v1167_v28, 8 }
  0xe5   : > { %v3788_v30 = vadd.s32 4294967169, %v435_v25 }
  0xe6   : > { %vm338_vm2 = vcmp.gt.s32.totalorder %v337_v26, 0  ;;  %vm1170_vm3 = vcmp.gt.s32.totalorder %v1169_v29, 0 }
  0xe7   : > { %v339_v31 = vsel %vm338_vm2, %v337_v26, 0  ;;  %v1171_v34 = vsel %vm1170_vm3, %v1169_v29, 0  ;;  %v4329_v38 = vadd.s32 1, %v3788_v30 }
  0xe8   : > { %v340_v32 = vshrl.u32 %v339_v31, 5  ;;  %v341_v33 = vand.u32 31, %v339_v31  ;;  %v4332_v42 = vshrl.u32 %v1171_v34, 5  ;;  %v1173_v43 = vand.u32 31, %v1171_v34 }
  0xe9   : > { %vm442_vm8 = vcmp.gt.s32.totalorder %v4329_v38, 0 }
  0xea   : > { %v342_v39 = vsub.s32 32, %v341_v33  ;;  %v344_v41 = vshll.u32 %v4193_v40, %v341_v33  ;;  %v347_v45 = vshll.u32 %v4194_v44, %v341_v33  ;;  %v350_v47 = vshll.u32 %v4195_v46, %v341_v33 }
  0xeb   : > { %v353_v49 = vshll.u32 %v4196_v48, %v341_v33  ;;  %v356_v51 = vshll.u32 %v4197_v50, %v341_v33  ;;  %vm359_vm4 = vcmp.lt.s32.totalorder %v340_v32, 1  ;;  %vm360_vm5 = vcmp.lt.s32.totalorder %v340_v32, 2 }
  0xec   : > { %v345_v52 = vshrl.u32 %v4194_v44, %v342_v39  ;;  %v348_v53 = vshrl.u32 %v4195_v46, %v342_v39  ;;  %v351_v54 = vshrl.u32 %v4196_v48, %v342_v39  ;;  %v343_v55 = vshrl.u32 %v4193_v40, %v342_v39 }
  0xed   : > { %v354_v56 = vshrl.u32 %v4197_v50, %v342_v39  ;;  %v357_v58 = vshrl.u32 %v4198_v57, %v342_v39  ;;  %v1174_v62 = vsub.s32 32, %v1173_v43  ;;  %vm361_vm6 = vcmp.lt.s32.totalorder %v340_v32, 3 }
  0xee   : > { %v346_v59 = vor.u32 %v345_v52, %v344_v41  ;;  %v349_v60 = vor.u32 %v348_v53, %v347_v45  ;;  %v352_v61 = vor.u32 %v351_v54, %v350_v47  ;;  %vm362_vm7 = vcmp.lt.s32.totalorder %v340_v32, 4 }
  0xef   : > { %v355_v63 = vor.u32 %v354_v56, %v353_v49  ;;  %v358_v0 = vor.u32 %v357_v58, %v356_v51  ;;  %v1176_v8 = vshll.u32 %v4193_v40, %v1173_v43  ;;  %v1177_v14 = vshrl.u32 %v4194_v44, %v1174_v62 }
  0xf0   : > { %v363_v1 = vsel %vm359_vm4, %v343_v55, %v346_v59  ;;  %v364_v2 = vsel %vm362_vm7, %v352_v61, 2102212464  ;;  %v367_v3 = vsel %vm359_vm4, %v346_v59, %v349_v60  ;;  %v371_v4 = vsel %vm359_vm4, %v349_v60, %v352_v61 }
  0xf1   : > { %v365_v5 = vsel %vm361_vm6, %v349_v60, %v364_v2  ;;  %v368_v6 = vsel %vm362_vm7, %v355_v63, 920167782  ;;  %v372_v7 = vsel %vm362_vm7, %v358_v0, 1326507024  ;;  %v1179_v16 = vshll.u32 %v4194_v44, %v1173_v43 }
  0xf2   : > { %v369_v9 = vsel %vm361_vm6, %v352_v61, %v368_v6  ;;  %v373_v10 = vsel %vm361_vm6, %v355_v63, %v372_v7  ;;  %v366_v18 = vsel %vm360_vm5, %v363_v1, %v365_v5  ;;  %v1180_v21 = vshrl.u32 %v4195_v46, %v1174_v62  ;;  %v4394_v5 = vpop.f32.mrf.mxu1 }
  0xf3   : > { %v370_v19 = vsel %vm360_vm5, %v367_v3, %v369_v9  ;;  %v374_v20 = vsel %vm360_vm5, %v371_v4, %v373_v10  ;;  %v1178_v26 = vor.u32 %v1177_v14, %v1176_v8  ;;  %v1182_v28 = vshll.u32 %v4195_v46, %v1173_v43 }
  0xf4   : > { %v4356_v22 = vmul.u32.u64.low %v4324_v35, %v374_v20  ;;  %v4357_v23 = vmul.u32.u64.high %v4324_v35, %v374_v20, %v4356_v22  ;;  %v4360_v24 = vmul.u32.u64.low %v4324_v35, %v370_v19  ;;  %v4361_v25 = vmul.u32.u64.high %v4324_v35, %v370_v19, %v4360_v24 }
  0xf5   : > { %v1181_v27 = vor.u32 %v1180_v21, %v1179_v16  ;;  %v1183_v29 = vshrl.u32 %v4196_v48, %v1174_v62  ;;  %v1175_v30 = vshrl.u32 %v4193_v40, %v1174_v62  ;;  %v1185_v31 = vshll.u32 %v4196_v48, %v1173_v43 }
  0xf6   : > { %v1186_v32 = vshrl.u32 %v4197_v50, %v1174_v62  ;;  %v1189_v33 = vshrl.u32 %v4198_v57, %v1174_v62  ;;  %v382_v34 = vmul.u32 %v4324_v35, %v366_v18  ;;  %v1188_v41 = vshll.u32 %v4197_v50, %v1173_v43 }
  0xf7   : > { %v1184_v39 = vor.u32 %v1183_v29, %v1182_v28  ;;  %vm1191_vm9 = vcmp.lt.s32.totalorder %v4332_v42, 1  ;;  %vm384_vm10 = vc.u32 %v4357_v23, %v4360_v24  ;;  %v385_v45 = vadd.s32 1, %v4361_v25 }
  0xf8   : > { %v1187_v47 = vor.u32 %v1186_v32, %v1185_v31  ;;  %vm1192_vm11 = vcmp.lt.s32.totalorder %v4332_v42, 2  ;;  %v1190_v49 = vor.u32 %v1189_v33, %v1188_v41  ;;  %vm1193_vm12 = vcmp.lt.s32.totalorder %v4332_v42, 3 }
  0xf9   : > { %vm1194_vm13 = vcmp.lt.s32.totalorder %v4332_v42, 4  ;;  %v1199_v51 = vsel %vm1191_vm9, %v1178_v26, %v1181_v27  ;;  %v386_v35 = vsel %vm384_vm10, %v385_v45, %v4361_v25  ;;  %v1203_v43 = vsel %vm1191_vm9, %v1181_v27, %v1184_v39 }
  0xfa   : > { %v1196_v52 = vsel %vm1194_vm13, %v1184_v39, 2102212464  ;;  %v1200_v53 = vsel %vm1194_vm13, %v1187_v47, 920167782  ;;  %v387_v54 = vadd.s32 %v386_v35, %v382_v34  ;;  %v1195_v55 = vsel %vm1191_vm9, %v1175_v30, %v1178_v26 }
  0xfb   : > { %v1201_v56 = vsel %vm1193_vm12, %v1184_v39, %v1200_v53  ;;  %v1204_v58 = vsel %vm1194_vm13, %v1190_v49, 1326507024  ;;  %v1197_v59 = vsel %vm1193_vm12, %v1181_v27, %v1196_v52  ;;  %v443_v62 = vsel %vm442_vm8, %v4329_v38, 0 }
  0xfc   : > { %v1202_v60 = vsel %vm1192_vm11, %v1199_v51, %v1201_v56  ;;  %v1205_v61 = vsel %vm1193_vm12, %v1187_v47, %v1204_v58  ;;  %v388_v63 = vadd.s32 536870912, %v387_v54  ;;  %v1198_v38 = vsel %vm1192_vm11, %v1195_v55, %v1197_v59 }
  0xfd   : > { %v1206_v0 = vsel %vm1192_vm11, %v1203_v43, %v1205_v61  ;;  %v4386_v1 = vmul.u32.u64.low %v4326_v36, %v1202_v60  ;;  %v4387_v2 = vmul.u32.u64.high %v4326_v36, %v1202_v60, %v4386_v1  ;;  %v438_v7 = vand.u32 8388607, %v431_v37 }
  0xfe   : > { %v4391_v3 = vmul.u32.u64.low %v4326_v36, %v1206_v0  ;;  %v4392_v4 = vmul.u32.u64.high %v4326_v36, %v1206_v0, %v4391_v3  ;;  %v4396_v6 = vshrl.u32 %v388_v63, 30  ;;  %v445_v8 = vand.u32 31, %v443_v62 }
  0xff   : > { %v1217_v10 = vadd.s32 1, %v4387_v2  ;;  %v1266_v14 = vand.u32 2139095040, %v4394_v5  ;;  %v1214_v16 = vmul.u32 %v4326_v36, %v1198_v38  ;;  %v439_v20 = vor.u32 8388608, %v438_v7 }
 0x100   : > { %v390_v9 = vshll.u32 %v4396_v6, 30  ;;  %vm1216_vm14 = vc.u32 %v4392_v4, %v4386_v1  ;;  %v446_v21 = vsub.s32 32, %v445_v8  ;;  %v4409_v27 = vshrl.u32 %v443_v62, 5 }
 0x101   : > { %v1218_v19 = vsel %vm1216_vm14, %v1217_v10, %v4387_v2  ;;  %v1267_v25 = vshrl.u32 %v1266_v14, 23  ;;  %v1263_v29 = vand.u32 2147483647, %v4394_v5  ;;  %v383_v30 = vadd.s32 %v4360_v24, %v4357_v23 }
 0x102   : > { %v391_v18 = vsub.s32 %v387_v54, %v390_v9  ;;  %v1219_v42 = vadd.s32 %v1218_v19, %v1214_v16  ;;  %v455_v31 = vshrl.u32 %v4196_v48, %v446_v21  ;;  %v4416_v32 = vshll.u32 %v439_v20, 8 }
 0x103   : > { %v449_v34 = vshrl.u32 %v4194_v44, %v446_v21  ;;  %v452_v39 = vshrl.u32 %v4195_v46, %v446_v21  ;;  %v3820_v41 = vadd.s32 4294967169, %v1267_v25  ;;  %v454_v47 = vshll.u32 %v4195_v46, %v445_v8 }
 0x104   : > { %v393_v22 = vsub.s32 0, %v391_v18  ;;  %v1220_v26 = vadd.s32 536870912, %v1219_v42  ;;  %v458_v23 = vshrl.u32 %v4197_v50, %v446_v21  ;;  %vm463_vm0 = vcmp.lt.s32.totalorder %v4409_v27, 1 }
 0x105   : > { %v448_v49 = vshll.u32 %v4193_v40, %v445_v8  ;;  %v451_v51 = vshll.u32 %v4194_v44, %v445_v8  ;;  %v457_v35 = vshll.u32 %v4196_v48, %v445_v8  ;;  %vm464_vm1 = vcmp.lt.s32.totalorder %v4409_v27, 2 }
 0x106   : > { %v3785_v28 = vmin.u32 %v393_v22, %v391_v18  ;;  %v4413_v36 = vshrl.u32 %v1220_v26, 30  ;;  %v456_v53 = vor.u32 %v455_v31, %v454_v47  ;;  %v461_v43 = vshrl.u32 %v4198_v57, %v446_v21 }
 0x107   : > { %vm465_vm2 = vcmp.lt.s32.totalorder %v4409_v27, 3  ;;  %v450_v54 = vor.u32 %v449_v34, %v448_v49  ;;  %v453_v55 = vor.u32 %v452_v39, %v451_v51  ;;  %v459_v56 = vor.u32 %v458_v23, %v457_v35 }
 0x108   : > { %v395_v33 = vclz %v3785_v28  ;;  %v1222_v45 = vshll.u32 %v4413_v36, 30  ;;  %v413_v59 = vsub.s32 4, %v4396_v6  ;;  %v460_v61 = vshll.u32 %v4197_v50, %v445_v8 }
 0x109   : > { %v447_v0 = vshrl.u32 %v4193_v40, %v446_v21  ;;  %vm466_vm4 = vcmp.lt.s32.totalorder %v4409_v27, 4  ;;  %vm4440_vm5 = vcmp.le.f32.partialorder %v327_v13, 0.7853982  ;;  %v471_v14 = vsel %vm463_vm0, %v450_v54, %v453_v55 }
 0x10a   : > { %v3786_v24 = vadd.s32 4294967294, %v395_v33  ;;  %v4429_v52 = vsub.s32 %v1219_v42, %v1222_v45  ;;  %v462_v7 = vor.u32 %v461_v43, %v460_v61  ;;  %v468_v9 = vsel %vm466_vm4, %v456_v53, 2102212464 }
 0x10b   : > { %v472_v16 = vsel %vm466_vm4, %v459_v56, 920167782  ;;  %v414_v13 = vsel %vm329_vm15, %v413_v59, %v4396_v6  ;;  %v467_v42 = vsel %vm463_vm0, %v447_v0, %v450_v54  ;;  %v475_v25 = vsel %vm463_vm0, %v453_v55, %v456_v53 }
 0x10c   : > { %vm3787_vm3 = vcmp.lt.s32.totalorder %v3786_v24, 0  ;;  %v1225_v60 = vsub.s32 0, %v4429_v52  ;;  %v473_v22 = vsel %vm465_vm2, %v456_v53, %v472_v16  ;;  %v469_v28 = vsel %vm465_vm2, %v453_v55, %v468_v9 }
 0x10d   : > { %v398_v58 = vsel %vm3787_vm3, 0, %v3786_v24  ;;  %v474_v6 = vsel %vm464_vm1, %v471_v14, %v473_v22  ;;  %v1273_v33 = vadd.s32 1, %v3820_v41  ;;  %v470_v41 = vsel %vm464_vm1, %v467_v42, %v469_v28 }
 0x10e   : > { %v399_v62 = vsub.s32 32, %v398_v58  ;;  %v403_v63 = vsub.s32 4294967266, %v398_v58  ;;  %v400_v3 = vshll.u32 %v391_v18, %v398_v58  ;;  %v3817_v38 = vmin.u32 %v1225_v60, %v4429_v52 }
 0x10f   : > { %v1215_v18 = vadd.s32 %v4386_v1, %v4392_v4  ;;  %v476_v1 = vsel %vm466_vm4, %v462_v7, 1326507024  ;;  %v4473_v39 = vmul.u32.u64.low %v4416_v32, %v474_v6  ;;  %v4474_v45 = vmul.u32.u64.high %v4416_v32, %v474_v6, %v4473_v39 }
 0x110   : > { %v401_v8 = vshrl.u32 %v383_v30, %v399_v62  ;;  %v404_v10 = vadd.s32 127, %v403_v63  ;;  %v1227_v19 = vclz %v3817_v38  ;;  %v477_v31 = vsel %vm465_vm2, %v459_v56, %v476_v1 }
 0x111   : > { %v478_v34 = vsel %vm464_vm1, %v475_v25, %v477_v31  ;;  %vm1274_vm7 = vcmp.gt.s32.totalorder %v1273_v33, 0  ;;  %v416_v43 = vsel %vm4440_vm5, 0, %v414_v13  ;;  %v1245_v54 = vsub.s32 4, %v4413_v36 }
 0x112   : > { %v402_v20 = vor.u32 %v401_v8, %v400_v3  ;;  %v405_v21 = vshll.u32 %v404_v10, 23  ;;  %v3818_v26 = vadd.s32 4294967294, %v1227_v19  ;;  %v1275_v55 = vsel %vm1274_vm7, %v1273_v33, 0 }
 0x113   : > { %v4478_v24 = vmul.u32.u64.low %v4416_v32, %v478_v34  ;;  %v4479_v49 = vmul.u32.u64.high %v4416_v32, %v478_v34, %v4478_v24  ;;  %v489_v60 = vadd.s32 1, %v4474_v45  ;;  %v486_v62 = vmul.u32 %v4416_v32, %v470_v41 }
 0x114   : > { %v406_v4 = vor.u32 4788187, %v405_v21  ;;  %v409_v30 = vcvt.s32.f32 %v402_v20  ;;  %vm3819_vm6 = vcmp.lt.s32.totalorder %v3818_v26, 0  ;;  %v1277_v27 = vand.u32 31, %v1275_v55 }
 0x115   : > { %v1230_v23 = vsel %vm3819_vm6, 0, %v3818_v26  ;;  %vm488_vm8 = vc.u32 %v4479_v49, %v4473_v39  ;;  %v420_v63 = vadd.s32 3, %v416_v43  ;;  %vm1161_vm9 = vcmp.lt.s32.totalorder %v4311_v12, 0 }
 0x116   : > { %v407_v47 = vand.u32 2147483647, %v406_v4  ;;  %v1231_v51 = vsub.s32 32, %v1230_v23  ;;  %v1235_v35 = vsub.s32 4294967266, %v1230_v23  ;;  %v1232_v56 = vshll.u32 %v4429_v52, %v1230_v23 }
 0x117   : > { %v490_v38 = vsel %vm488_vm8, %v489_v60, %v4474_v45  ;;  %v4495_v9 = vsub.s32 32, %v1277_v27  ;;  %vm4502_vm10 = vcmp.le.f32.partialorder %v1159_v15, 0.7853982  ;;  %v1246_v14 = vsel %vm1161_vm9, %v1245_v54, %v4413_v36 }
 0x118   : > { %v410_v53 = vmul.f32 %v409_v30, %v407_v47  ;;  %v1233_v58 = vshrl.u32 %v1215_v18, %v1231_v51  ;;  %v1236_v59 = vadd.s32 127, %v1235_v35  ;;  %v491_v52 = vadd.s32 %v490_v38, %v486_v62 }
 0x119   : > { %v4509_v16 = vand.u32 3, %v416_v43  ;;  %v1270_v18 = vand.u32 8388607, %v1263_v29  ;;  %v4513_v2 = vand.u32 3, %v420_v63  ;;  %v1248_v42 = vsel %vm4502_vm10, 0, %v1246_v14 }
 0x11a   : > { %v411_v61 = vxor.u32 2147483648, %v410_v53  ;;  %v1234_v0 = vor.u32 %v1233_v58, %v1232_v56  ;;  %v1237_v3 = vshll.u32 %v1236_v59, 23  ;;  %v492_v13 = vadd.s32 536870912, %v491_v52 }
 0x11b   : > { %v1281_v36 = vshrl.u32 %v4194_v44, %v4495_v9  ;;  %v1284_v21 = vshrl.u32 %v4195_v46, %v4495_v9  ;;  %v1287_v25 = vshrl.u32 %v4196_v48, %v4495_v9  ;;  %v1289_v26 = vshll.u32 %v4196_v48, %v1277_v27 }
 0x11c   : > { %v412_v7 = vsel %vm329_vm15, %v411_v61, %v410_v53  ;;  %v1238_v10 = vor.u32 4788187, %v1237_v3  ;;  %v1241_v15 = vcvt.s32.f32 %v1234_v0  ;;  %v4517_v20 = vshrl.u32 %v492_v13, 30 }
 0x11d   : > { %v415_v32 = vsel %vm4440_vm5, %v4309_v11, %v412_v7  ;;  %v1290_v28 = vshrl.u32 %v4197_v50, %v4495_v9  ;;  %v4529_v1 = vshrl.u32 %v1275_v55, 5  ;;  %v1280_v4 = vshll.u32 %v4193_v40, %v1277_v27 }
 0x11e   : > { %4050 = vcosq.f32 %v415_v32  ;;  %v1239_v19 = vand.u32 2147483647, %v1238_v10  ;;  %v494_v6 = vshll.u32 %v4517_v20, 30  ;;  %v1283_v30 = vshll.u32 %v4194_v44, %v1277_v27 }
 0x11f   : > { %4052 = vsinq.f32 %v415_v32  ;;  %v1286_v33 = vshll.u32 %v4195_v46, %v1277_v27  ;;  %v1291_v34 = vor.u32 %v1290_v28, %v1289_v26  ;;  %v1293_v45 = vshrl.u32 %v4198_v57, %v4495_v9 }
 0x120   : > { %v1242_v22 = vmul.f32 %v1241_v15, %v1239_v19  ;;  %v4536_v47 = vsub.s32 %v491_v52, %v494_v6  ;;  %v1271_v23 = vor.u32 8388608, %v1270_v18  ;;  %v1282_v24 = vor.u32 %v1281_v36, %v1280_v4  ;;  %v4608_v6 = vpop.f32.mrf.mxu0 }
 0x121   : > { %v1285_v51 = vor.u32 %v1284_v21, %v1283_v30  ;;  %vm2105_vm11 = vcmp.eq.s32.totalorder %v4509_v16, 2  ;;  %v1252_v41 = vadd.s32 3, %v1248_v42  ;;  %v1288_v53 = vor.u32 %v1287_v25, %v1286_v33 }
 0x122   : > { %v1243_v31 = vxor.u32 2147483648, %v1242_v22  ;;  %v1292_v43 = vshll.u32 %v4197_v50, %v1277_v27  ;;  %vm423_vm12 = vcmp.eq.s32.totalorder %v4513_v2, 0  ;;  %vm2102_vm13 = vcmp.eq.s32.totalorder %v4509_v16, 0 }
 0x123   : > { %v497_v55 = vsub.s32 0, %v4536_v47  ;;  %vm1298_vm14 = vcmp.lt.s32.totalorder %v4529_v1, 4  ;;  %vm422_vm15 = vcmp.lt.s32.totalorder %v4513_v2, 2  ;;  %vm2101_vm0 = vcmp.lt.s32.totalorder %v4509_v16, 2 }
 0x124   : > { %v1244_v35 = vsel %vm1161_vm9, %v1243_v31, %v1242_v22  ;;  %v1294_v56 = vor.u32 %v1293_v45, %v1292_v43  ;;  %vm1295_vm1 = vcmp.lt.s32.totalorder %v4529_v1, 1  ;;  %v1304_v58 = vsel %vm1298_vm14, %v1291_v34, 920167782 }
 0x125   : > { %v1247_v54 = vsel %vm4502_vm10, %v4311_v12, %v1244_v35  ;;  %vm419_vm2 = vweird.f32 %v4309_v11  ;;  %v3789_v59 = vmin.u32 %v497_v55, %v4536_v47  ;;  %vm1297_vm3 = vcmp.lt.s32.totalorder %v4529_v1, 3 }
 0x126   : > { %4054 = vcosq.f32 %v1247_v54  ;;  %v1303_v60 = vsel %vm1295_vm1, %v1282_v24, %v1285_v51  ;;  %vm426_vm4 = vcmp.eq.s32.totalorder %v4513_v2, 2  ;;  %v4561_v61 = vand.u32 3, %v1252_v41 }
 0x127   : > { %4056 = vsinq.f32 %v1247_v54  ;;  %v4563_v62 = vand.u32 3, %v1248_v42  ;;  %v1305_v27 = vsel %vm1297_vm3, %v1288_v53, %v1304_v58  ;;  %v487_v63 = vadd.s32 %v4473_v39, %v4479_v49 }
 0x128   : > { %v499_v0 = vclz %v3789_v59  ;;  %vm1296_vm5 = vcmp.lt.s32.totalorder %v4529_v1, 2  ;;  %v4570_v3 = vshll.u32 %v1271_v23, 8  ;;  %vm433_vm6 = vcmp.lt.s32.totalorder %v4317_v17, 0 }
 0x129   : > { %v1279_v7 = vshrl.u32 %v4193_v40, %v4495_v9  ;;  %v1300_v52 = vsel %vm1298_vm14, %v1288_v53, 2102212464  ;;  %v1306_v32 = vsel %vm1296_vm5, %v1303_v60, %v1305_v27  ;;  %v1308_v39 = vsel %vm1298_vm14, %v1294_v56, 1326507024 }
 0x12a   : > { %v3790_v10 = vadd.s32 4294967294, %v499_v0  ;;  %v1307_v14 = vsel %vm1295_vm1, %v1285_v51, %v1288_v53  ;;  %v1309_v9 = vsel %vm1297_vm3, %v1291_v34, %v1308_v39  ;;  %vm2929_vm7 = vcmp.eq.s32.totalorder %v4563_v62, 2  ;;  %v4635_v53 = vpop.f32.mrf.mxu1 }
 0x12b   : > { %v4051_v38 = vpop.eup %4050  ;;  %v1299_v18 = vsel %vm1295_vm1, %v1279_v7, %v1282_v24  ;;  %v4590_v19 = vmul.u32.u64.low %v4570_v3, %v1306_v32  ;;  %v4591_v15 = vmul.u32.u64.high %v4570_v3, %v1306_v32, %v4590_v19  ;;  %v1301_v21 = vsel %vm1297_vm3, %v1285_v51, %v1300_v52 }
 0x12c   : > { %v4053_v49 = vpop.eup %4052  ;;  %v427_v8 = vxor.u32 2147483648, %v4051_v38  ;;  %vm3791_vm8 = vcmp.lt.s32.totalorder %v3790_v10, 0  ;;  %vm2926_vm9 = vcmp.eq.s32.totalorder %v4563_v62, 0  ;;  %v1310_v28 = vsel %vm1296_vm5, %v1307_v14, %v1309_v9 }
 0x12d   : > { %v424_v13 = vxor.u32 2147483648, %v4053_v49  ;;  %v502_v26 = vsel %vm3791_vm8, 0, %v3790_v10  ;;  %vm2925_vm10 = vcmp.lt.s32.totalorder %v4563_v62, 2  ;;  %v517_v33 = vsub.s32 4, %v4517_v20 }
 0x12e   : > { %v428_v42 = vsel %vm426_vm4, %v427_v8, %v4053_v49  ;;  %v2107_v36 = vsel %vm2105_vm11, %v427_v8, %v4053_v49  ;;  %v503_v31 = vsub.s32 32, %v502_v26  ;;  %vm1251_vm11 = vweird.f32 %v4311_v12 }
 0x12f   : > { %v425_v22 = vsel %vm423_vm12, %v4051_v38, %v424_v13  ;;  %v2104_v25 = vsel %vm2102_vm13, %v4051_v38, %v424_v13  ;;  %v507_v23 = vsub.s32 4294967266, %v502_v26  ;;  %v1302_v2 = vsel %vm1296_vm5, %v1299_v18, %v1301_v21 }
 0x130   : > { %v429_v4 = vsel %vm422_vm15, %v425_v22, %v428_v42  ;;  %v2108_v30 = vsel %vm2101_vm0, %v2104_v25, %v2107_v36  ;;  %v505_v16 = vshrl.u32 %v487_v63, %v503_v31  ;;  %v538_v11 = vand.u32 2139095040, %v4608_v6 }
 0x131   : > { %v430_v34 = vsel %vm419_vm2, nan, %v429_v4  ;;  %v2109_v45 = vsel %vm419_vm2, nan, %v2108_v30  ;;  %v4628_v24 = vmul.u32.u64.low %v4570_v3, %v1310_v28  ;;  %v4629_v51 = vmul.u32.u64.high %v4570_v3, %v1310_v28, %v4628_v24 }
 0x132   : > { %1991 = vst [vmem:[%s4623_s28] sm:$0xff] %v430_v34  ;;  %3655 = vst [vmem:[%s4623_s28 + $0x80] sm:$0xff] %v2109_v45  ;;  %vm1254_vm12 = vcmp.lt.s32.totalorder %v4561_v61, 2  ;;  %v504_v35 = vshll.u32 %v4536_v47, %v502_v26  ;;  %v508_v41 = vadd.s32 127, %v507_v23  ;;  %v1321_v1 = vadd.s32 1, %v4591_v15 }
 0x133   : > { %v4055_v43 = vpop.eup %4054  ;;  %vm1255_vm13 = vcmp.eq.s32.totalorder %v4561_v61, 0  ;;  %vm1258_vm14 = vcmp.eq.s32.totalorder %v4561_v61, 2  ;;  %v518_v54 = vsel %vm433_vm6, %v517_v33, %v4517_v20  ;;  %v539_v55 = vshrl.u32 %v538_v11, 23 }
 0x134   : > { %v4057_v56 = vpop.eup %4056  ;;  %v1259_v58 = vxor.u32 2147483648, %v4055_v43  ;;  %v506_v59 = vor.u32 %v505_v16, %v504_v35  ;;  %v509_v60 = vshll.u32 %v508_v41, 23  ;;  %v1318_v47 = vmul.u32 %v4570_v3, %v1302_v2 }
 0x135   : > { %v1256_v27 = vxor.u32 2147483648, %v4057_v56  ;;  %vm1320_vm15 = vc.u32 %v4629_v51, %v4590_v19  ;;  %v535_v63 = vand.u32 2147483647, %v4608_v6  ;;  %v1370_v0 = vand.u32 2139095040, %v4635_v53 }
 0x136   : > { %v1260_v38 = vsel %vm1258_vm14, %v1259_v58, %v4057_v56  ;;  %v2931_v20 = vsel %vm2929_vm7, %v1259_v58, %v4057_v56  ;;  %v510_v7 = vor.u32 4788187, %v509_v60  ;;  %v1322_v52 = vsel %vm1320_vm15, %v1321_v1, %v4591_v15 }
 0x137   : > { %v1257_v3 = vsel %vm1255_vm13, %v4055_v43, %v1256_v27  ;;  %v2928_v32 = vsel %vm2926_vm9, %v4055_v43, %v1256_v27  ;;  %v1323_v39 = vadd.s32 %v1322_v52, %v1318_v47  ;;  %v3792_v49 = vadd.s32 4294967169, %v539_v55 }
 0x138   : > { %v1261_v8 = vsel %vm1254_vm12, %v1257_v3, %v1260_v38  ;;  %v2932_v10 = vsel %vm2925_vm10, %v2928_v32, %v2931_v20  ;;  %v511_v14 = vand.u32 2147483647, %v510_v7  ;;  %v513_v9 = vcvt.s32.f32 %v506_v59 }
 0x139   : > { %v1262_v13 = vsel %vm1251_vm11, nan, %v1261_v8  ;;  %v2933_v18 = vsel %vm1251_vm11, nan, %v2932_v10  ;;  %v1324_v15 = vadd.s32 536870912, %v1323_v39  ;;  %v545_v42 = vadd.s32 1, %v3792_v49 }
 0x13a   : > { %1999 = vst [vmem:[%s4623_s28 + $0x40] sm:$0xff] %v1262_v13  ;;  %3663 = vst [vmem:[%s4623_s28 + $0xc0] sm:$0xff] %v2933_v18  ;;  %vm432_vm0 = vcmp.le.f32.partialorder %v431_v37, 0.7853982  ;;  %v514_v61 = vmul.f32 %v513_v9, %v511_v14  ;;  %v542_v62 = vand.u32 8388607, %v535_v63  ;;  %v1319_v35 = vadd.s32 %v4590_v19, %v4629_v51 }
 0x13b   : > { %v520_v36 = vsel %vm432_vm0, 0, %v518_v54  ;;  %v1325_v21 = vshrl.u32 %v1324_v15, 30  ;;  %vm546_vm1 = vcmp.gt.s32.totalorder %v545_v42, 0  ;;  %v1371_v12 = vshrl.u32 %v1370_v0, 23 }
 0x13c   : > { %v515_v22 = vxor.u32 2147483648, %v514_v61  ;;  %v547_v25 = vsel %vm546_vm1, %v545_v42, 0  ;;  %v524_v30 = vadd.s32 3, %v520_v36  ;;  %v1367_v31 = vand.u32 2147483647, %v4635_v53 }
 0x13d   : > { %v1326_v26 = vshll.u32 %v1325_v21, 30  ;;  %v549_v28 = vand.u32 31, %v547_v25  ;;  %v543_v34 = vor.u32 8388608, %v542_v62  ;;  %v4674_v23 = vand.u32 3, %v520_v36 }
 0x13e   : > { %v516_v4 = vsel %vm433_vm6, %v515_v22, %v514_v61  ;;  %vm1265_vm2 = vcmp.lt.s32.totalorder %v4394_v5, 0  ;;  %v1349_v16 = vsub.s32 4, %v1325_v21  ;;  %v3824_v24 = vadd.s32 4294967169, %v1371_v12 }
 0x13f   : > { %v519_v37 = vsel %vm432_vm0, %v4317_v17, %v516_v4  ;;  %v4672_v33 = vsub.s32 %v1323_v39, %v1326_v26  ;;  %v550_v45 = vsub.s32 32, %v549_v28  ;;  %v4678_v11 = vand.u32 3, %v524_v30 }
 0x140   : > { %4058 = vcosq.f32 %v519_v37  ;;  %v552_v54 = vshll.u32 %v4193_v40, %v549_v28  ;;  %v4686_v55 = vshll.u32 %v543_v34, 8  ;;  %v4690_v56 = vand.u32 8388607, %v1367_v31 }
 0x141   : > { %4060 = vsinq.f32 %v519_v37  ;;  %v1329_v2 = vsub.s32 0, %v4672_v33  ;;  %v553_v41 = vshrl.u32 %v4194_v44, %v550_v45  ;;  %v556_v1 = vshrl.u32 %v4195_v46, %v550_v45 }
 0x142   : > { %v4692_v58 = vshrl.u32 %v547_v25, 5  ;;  %v555_v59 = vshll.u32 %v4194_v44, %v549_v28  ;;  %v558_v19 = vshll.u32 %v4195_v46, %v549_v28  ;;  %v559_v51 = vshrl.u32 %v4196_v48, %v550_v45 }
 0x143   : > { %v3821_v43 = vmin.u32 %v1329_v2, %v4672_v33  ;;  %v4699_v47 = vsel %vm1265_vm2, %v1349_v16, %v1325_v21  ;;  %v554_v27 = vor.u32 %v553_v41, %v552_v54  ;;  %v1377_v0 = vadd.s32 1, %v3824_v24 }
 0x144   : > { %v557_v38 = vor.u32 %v556_v1, %v555_v59  ;;  %v560_v20 = vor.u32 %v559_v51, %v558_v19  ;;  %v561_v7 = vshll.u32 %v4196_v48, %v549_v28  ;;  %v562_v52 = vshrl.u32 %v4197_v50, %v550_v45 }
 0x145   : > { %v1331_v60 = vclz %v3821_v43  ;;  %vm530_vm3 = vcmp.eq.s32.totalorder %v4678_v11, 2  ;;  %vm2208_vm4 = vcmp.eq.s32.totalorder %v4674_v23, 2  ;;  %v551_v32 = vshrl.u32 %v4193_v40, %v550_v45 }
 0x146   : > { %v564_v39 = vshll.u32 %v4197_v50, %v549_v28  ;;  %v565_v49 = vshrl.u32 %v4198_v57, %v550_v45  ;;  %vm527_vm5 = vcmp.eq.s32.totalorder %v4678_v11, 0  ;;  %vm2205_vm6 = vcmp.eq.s32.totalorder %v4674_v23, 0 }
 0x147   : > { %v3822_v3 = vadd.s32 4294967294, %v1331_v60  ;;  %v563_v8 = vor.u32 %v562_v52, %v561_v7  ;;  %vm567_vm7 = vcmp.lt.s32.totalorder %v4692_v58, 1  ;;  %vm568_vm8 = vcmp.lt.s32.totalorder %v4692_v58, 2 }
 0x148   : > { %vm570_vm9 = vcmp.lt.s32.totalorder %v4692_v58, 4  ;;  %vm526_vm10 = vcmp.lt.s32.totalorder %v4678_v11, 2  ;;  %vm2204_vm11 = vcmp.lt.s32.totalorder %v4674_v23, 2  ;;  %v566_v10 = vor.u32 %v565_v49, %v564_v39 }
 0x149   : > { %vm3823_vm12 = vcmp.lt.s32.totalorder %v3822_v3, 0  ;;  %vm569_vm13 = vcmp.lt.s32.totalorder %v4692_v58, 3  ;;  %v572_v14 = vsel %vm570_vm9, %v560_v20, 2102212464  ;;  %vm523_vm14 = vweird.f32 %v4317_v17 }
 0x14a   : > { %v1334_v9 = vsel %vm3823_vm12, 0, %v3822_v3  ;;  %v571_v13 = vsel %vm567_vm7, %v551_v32, %v554_v27  ;;  %v575_v18 = vsel %vm567_vm7, %v554_v27, %v557_v38  ;;  %v576_v15 = vsel %vm570_vm9, %v563_v8, 920167782 }
 0x14b   : > { %vm4727_vm15 = vcmp.le.f32.partialorder %v1263_v29, 0.7853982  ;;  %v1335_v61 = vsub.s32 32, %v1334_v9  ;;  %v1339_v36 = vsub.s32 4294967266, %v1334_v9  ;;  %v573_v21 = vsel %vm569_vm13, %v557_v38, %v572_v14 }
 0x14c   : > { %v579_v62 = vsel %vm567_vm7, %v557_v38, %v560_v20  ;;  %v1336_v22 = vshll.u32 %v4672_v33, %v1334_v9  ;;  %v577_v25 = vsel %vm569_vm13, %v560_v20, %v576_v15  ;;  %v580_v26 = vsel %vm570_vm9, %v566_v10, 1326507024 }
 0x14d   : > { %vm1378_vm0 = vcmp.gt.s32.totalorder %v1377_v0, 0  ;;  %v4059_v29 = vpop.eup %4058  ;;  %v1337_v28 = vshrl.u32 %v1319_v35, %v1335_v61  ;;  %v1340_v12 = vadd.s32 127, %v1339_v36  ;;  %v578_v4 = vsel %vm568_vm8, %v575_v18, %v577_v25 }
 0x14e   : > { %v581_v30 = vsel %vm569_vm13, %v563_v8, %v580_v26  ;;  %v4061_v37 = vpop.eup %4060  ;;  %v531_v34 = vxor.u32 2147483648, %v4059_v29  ;;  %v4747_v45 = vmul.u32.u64.low %v4686_v55, %v578_v4  ;;  %v4748_v2 = vmul.u32.u64.high %v4686_v55, %v578_v4, %v4747_v45 }
 0x14f   : > { %v582_v33 = vsel %vm568_vm8, %v579_v62, %v581_v30  ;;  %v528_v16 = vxor.u32 2147483648, %v4061_v37  ;;  %v1338_v24 = vor.u32 %v1337_v28, %v1336_v22  ;;  %v1341_v35 = vshll.u32 %v1340_v12, 23 }
 0x150   : > { %v1379_v41 = vsel %vm1378_vm0, %v1377_v0, 0  ;;  %v532_v1 = vsel %vm530_vm3, %v531_v34, %v4061_v37  ;;  %v2210_v43 = vsel %vm2208_vm4, %v531_v34, %v4061_v37  ;;  %v574_v27 = vsel %vm568_vm8, %v571_v13, %v573_v21 }
 0x151   : > { %v4756_v54 = vmul.u32.u64.low %v4686_v55, %v582_v33  ;;  %v4757_v59 = vmul.u32.u64.high %v4686_v55, %v582_v33, %v4756_v54  ;;  %v529_v19 = vsel %vm527_vm5, %v4059_v29, %v528_v16  ;;  %v2207_v51 = vsel %vm2205_vm6, %v4059_v29, %v528_v16 }
 0x152   : > { %v1342_v60 = vor.u32 4788187, %v1341_v35  ;;  %v533_v0 = vsel %vm526_vm10, %v529_v19, %v532_v1  ;;  %v2211_v38 = vsel %vm2204_vm11, %v2207_v51, %v2210_v43  ;;  %v1345_v20 = vcvt.s32.f32 %v1338_v24 }
 0x153   : > { %v593_v7 = vadd.s32 1, %v4748_v2  ;;  %v534_v52 = vsel %vm523_vm14, nan, %v533_v0  ;;  %v2212_v3 = vsel %vm523_vm14, nan, %v2211_v38  ;;  %v1381_v39 = vand.u32 31, %v1379_v41 }
 0x154   : > { %v1343_v32 = vand.u32 2147483647, %v1342_v60  ;;  %1992 = vst [vmem:[%s4623_s28 + $0x8] sm:$0xff] %v534_v52  ;;  %3656 = vst [vmem:[%s4623_s28 + $0x88] sm:$0xff] %v2212_v3  ;;  %v1352_v11 = vsel %vm4727_vm15, 0, %v4699_v47  ;;  %v590_v23 = vmul.u32 %v4686_v55, %v574_v27  ;;  %vm592_vm1 = vc.u32 %v4757_v59, %v4747_v45 }
 0x155   : > { %v1375_v58 = vor.u32 8388608, %v4690_v56  ;;  %v594_v8 = vsel %vm592_vm1, %v593_v7, %v4748_v2  ;;  %v1380_v17 = vshrl.u32 %v1379_v41, 5  ;;  %v1382_v10 = vsub.s32 32, %v1381_v39 }
 0x156   : > { %v1346_v49 = vmul.f32 %v1345_v20, %v1343_v32  ;;  %v595_v14 = vadd.s32 %v594_v8, %v590_v23  ;;  %v1384_v9 = vshll.u32 %v4193_v40, %v1381_v39  ;;  %v1387_v13 = vshll.u32 %v4194_v44, %v1381_v39  ;;  %v4809_v20 = vpop.f32.mrf.mxu0 }
 0x157   : > { %v1390_v18 = vshll.u32 %v4195_v46, %v1381_v39  ;;  %v1385_v55 = vshrl.u32 %v4194_v44, %v1382_v10  ;;  %v1388_v15 = vshrl.u32 %v4195_v46, %v1382_v10  ;;  %v1393_v61 = vshll.u32 %v4196_v48, %v1381_v39 }
 0x158   : > { %v1347_v47 = vxor.u32 2147483648, %v1346_v49  ;;  %v596_v56 = vadd.s32 536870912, %v595_v14  ;;  %v1391_v36 = vshrl.u32 %v4196_v48, %v1382_v10  ;;  %v1394_v21 = vshrl.u32 %v4197_v50, %v1382_v10 }
 0x159   : > { %v1396_v62 = vshll.u32 %v4197_v50, %v1381_v39  ;;  %v1386_v25 = vor.u32 %v1385_v55, %v1384_v9  ;;  %v1389_v26 = vor.u32 %v1388_v15, %v1387_v13  ;;  %v1397_v29 = vshrl.u32 %v4198_v57, %v1382_v10 }
 0x15a   : > { %v1348_v22 = vsel %vm1265_vm2, %v1347_v47, %v1346_v49  ;;  %v597_v12 = vshrl.u32 %v596_v56, 30  ;;  %v1392_v4 = vor.u32 %v1391_v36, %v1390_v18  ;;  %v1395_v30 = vor.u32 %v1394_v21, %v1393_v61 }
 0x15b   : > { %v1351_v28 = vsel %vm4727_vm15, %v4394_v5, %v1348_v22  ;;  %v1356_v37 = vadd.s32 3, %v1352_v11  ;;  %v1398_v34 = vor.u32 %v1397_v29, %v1396_v62  ;;  %vm1399_vm3 = vcmp.lt.s32.totalorder %v1380_v17, 1 }
 0x15c   : > { %4062 = vcosq.f32 %v1351_v28  ;;  %v598_v33 = vshll.u32 %v597_v12, 30  ;;  %vm1400_vm4 = vcmp.lt.s32.totalorder %v1380_v17, 2  ;;  %vm1402_vm5 = vcmp.lt.s32.totalorder %v1380_v17, 4 }
 0x15d   : > { %4064 = vsinq.f32 %v1351_v28  ;;  %v1383_v2 = vshrl.u32 %v4193_v40, %v1382_v10  ;;  %vm1401_vm2 = vcmp.lt.s32.totalorder %v1380_v17, 3  ;;  %v1407_v16 = vsel %vm1399_vm3, %v1386_v25, %v1389_v26 }
 0x15e   : > { %v1408_v24 = vsel %vm1402_vm5, %v1395_v30, 920167782  ;;  %v4801_v35 = vsub.s32 %v595_v14, %v598_v33  ;;  %v1404_v42 = vsel %vm1402_vm5, %v1392_v4, 2102212464  ;;  %v1411_v1 = vsel %vm1399_vm3, %v1389_v26, %v1392_v4 }
 0x15f   : > { %v1409_v41 = vsel %vm1401_vm2, %v1392_v4, %v1408_v24  ;;  %v3027_v43 = vand.u32 3, %v1352_v11  ;;  %v1412_v19 = vsel %vm1402_vm5, %v1398_v34, 1326507024  ;;  %v1415_v51 = vshll.u32 %v1375_v58, 8 }
 0x160   : > { %v1410_v54 = vsel %vm1400_vm4, %v1407_v16, %v1409_v41  ;;  %v601_v60 = vsub.s32 0, %v4801_v35  ;;  %v621_v27 = vsub.s32 4, %v597_v12  ;;  %v1403_v0 = vsel %vm1399_vm3, %v1383_v2, %v1386_v25 }
 0x161   : > { %v1413_v38 = vsel %vm1401_vm2, %v1395_v30, %v1412_v19  ;;  %v1405_v7 = vsel %vm1401_vm2, %v1389_v26, %v1404_v42  ;;  %v4813_v3 = vmul.u32.u64.low %v1415_v51, %v1410_v54  ;;  %v4814_v32 = vmul.u32.u64.high %v1415_v51, %v1410_v54, %v4813_v3 }
 0x162   : > { %v1414_v52 = vsel %vm1400_vm4, %v1411_v1, %v1413_v38  ;;  %v1357_v39 = vand.u32 3, %v1356_v37  ;;  %vm4819_vm6 = vcmp.le.f32.partialorder %v535_v63, 0.7853982  ;;  %v3793_v23 = vmin.u32 %v601_v60, %v4801_v35 }
 0x163   : > { %vm537_vm7 = vcmp.lt.s32.totalorder %v4608_v6, 0  ;;  %v4825_v58 = vmul.u32.u64.low %v1415_v51, %v1414_v52  ;;  %v4826_v49 = vmul.u32.u64.high %v1415_v51, %v1414_v52, %v4825_v58  ;;  %v642_v8 = vand.u32 2139095040, %v4809_v20 }
 0x164   : > { %vm3028_vm8 = vcmp.lt.s32.totalorder %v3027_v43, 2  ;;  %v603_v10 = vclz %v3793_v23  ;;  %v1406_v14 = vsel %vm1400_vm4, %v1403_v0, %v1405_v7  ;;  %v639_v9 = vand.u32 2147483647, %v4809_v20 }
 0x165   : > { %vm1355_vm9 = vweird.f32 %v4394_v5  ;;  %vm3029_vm10 = vcmp.eq.s32.totalorder %v3027_v43, 0  ;;  %v622_v63 = vsel %vm537_vm7, %v621_v27, %v597_v12  ;;  %v1425_v13 = vadd.s32 1, %v4814_v32 }
 0x166   : > { %v643_v18 = vshrl.u32 %v642_v8, 23  ;;  %vm1358_vm11 = vcmp.lt.s32.totalorder %v1357_v39, 2  ;;  %vm1359_vm12 = vcmp.eq.s32.totalorder %v1357_v39, 0  ;;  %vm3032_vm13 = vcmp.eq.s32.totalorder %v3027_v43, 2 }
 0x167   : > { %v3794_v47 = vadd.s32 4294967294, %v603_v10  ;;  %vm1362_vm14 = vcmp.eq.s32.totalorder %v1357_v39, 2  ;;  %v1422_v55 = vmul.u32 %v1415_v51, %v1406_v14  ;;  %vm1424_vm15 = vc.u32 %v4826_v49, %v4813_v3  ;;  %v4853_v51 = vpop.f32.mrf.mxu1 }
 0x168   : > { %v3796_v17 = vadd.s32 4294967169, %v643_v18  ;;  %v591_v61 = vadd.s32 %v4747_v45, %v4757_v59  ;;  %v624_v56 = vsel %vm4819_vm6, 0, %v622_v63  ;;  %v1426_v36 = vsel %vm1424_vm15, %v1425_v13, %v4814_v32 }
 0x169   : > { %v4063_v15 = vpop.eup %4062  ;;  %vm3795_vm0 = vcmp.lt.s32.totalorder %v3794_v47, 0  ;;  %v1427_v25 = vadd.s32 %v1426_v36, %v1422_v55  ;;  %v628_v60 = vadd.s32 3, %v624_v56  ;;  %v646_v43 = vand.u32 8388607, %v639_v9 }
 0x16a   : > { %v4065_v21 = vpop.eup %4064  ;;  %v1363_v62 = vxor.u32 2147483648, %v4063_v15  ;;  %v606_v22 = vsel %vm3795_vm0, 0, %v3794_v47  ;;  %v649_v26 = vadd.s32 1, %v3796_v17  ;;  %v1474_v32 = vand.u32 2139095040, %v4853_v51 }
 0x16b   : > { %v1360_v29 = vxor.u32 2147483648, %v4065_v21  ;;  %v607_v28 = vsub.s32 32, %v606_v22  ;;  %v608_v12 = vshll.u32 %v4801_v35, %v606_v22  ;;  %v611_v4 = vsub.s32 4294967266, %v606_v22 }
 0x16c   : > { %v1364_v30 = vsel %vm1362_vm14, %v1363_v62, %v4065_v21  ;;  %v3034_v45 = vsel %vm3032_vm13, %v1363_v62, %v4065_v21  ;;  %v1428_v59 = vadd.s32 536870912, %v1427_v25  ;;  %vm650_vm1 = vcmp.gt.s32.totalorder %v649_v26, 0 }
 0x16d   : > { %v1361_v37 = vsel %vm1359_vm12, %v4063_v15, %v1360_v29  ;;  %v3031_v34 = vsel %vm3029_vm10, %v4063_v15, %v1360_v29  ;;  %v609_v33 = vshrl.u32 %v591_v61, %v607_v28  ;;  %v612_v2 = vadd.s32 127, %v611_v4 }
 0x16e   : > { %v1365_v16 = vsel %vm1358_vm11, %v1361_v37, %v1364_v30  ;;  %v3035_v24 = vsel %vm3028_vm8, %v3031_v34, %v3034_v45  ;;  %v1429_v35 = vshrl.u32 %v1428_v59, 30  ;;  %v651_v42 = vsel %vm650_vm1, %v649_v26, 0 }
 0x16f   : > { %v1366_v41 = vsel %vm1355_vm9, nan, %v1365_v16  ;;  %v3036_v1 = vsel %vm1355_vm9, nan, %v3035_v24  ;;  %v610_v54 = vor.u32 %v609_v33, %v608_v12  ;;  %v613_v19 = vshll.u32 %v612_v2, 23 }
 0x170   : > { %2000 = vst [vmem:[%s4623_s28 + $0x48] sm:$0xff] %v1366_v41  ;;  %3664 = vst [vmem:[%s4623_s28 + $0xc8] sm:$0xff] %v3036_v1  ;;  %v1430_v27 = vshll.u32 %v1429_v35, 30  ;;  %v653_v0 = vand.u32 31, %v651_v42  ;;  %v4862_v23 = vand.u32 3, %v624_v56  ;;  %vm1369_vm3 = vcmp.lt.s32.totalorder %v4635_v53, 0 }
 0x171   : > { %v614_v38 = vor.u32 4788187, %v613_v19  ;;  %v617_v39 = vcvt.s32.f32 %v610_v54  ;;  %v4865_v58 = vand.u32 3, %v628_v60  ;;  %v1423_v8 = vadd.s32 %v4813_v3, %v4826_v49 }
 0x172   : > { %v4859_v7 = vsub.s32 %v1427_v25, %v1430_v27  ;;  %v654_v52 = vsub.s32 32, %v653_v0  ;;  %v647_v14 = vor.u32 8388608, %v646_v43  ;;  %v656_v17 = vshll.u32 %v4193_v40, %v653_v0 }
 0x173   : > { %v615_v5 = vand.u32 2147483647, %v614_v38  ;;  %v659_v15 = vshll.u32 %v4194_v44, %v653_v0  ;;  %v1475_v61 = vshrl.u32 %v1474_v32, 23  ;;  %v1453_v36 = vsub.s32 4, %v1429_v35 }
 0x174   : > { %v1433_v10 = vsub.s32 0, %v4859_v7  ;;  %v657_v13 = vshrl.u32 %v4194_v44, %v654_v52  ;;  %v660_v18 = vshrl.u32 %v4195_v46, %v654_v52  ;;  %v663_v47 = vshrl.u32 %v4196_v48, %v654_v52 }
 0x175   : > { %v618_v63 = vmul.f32 %v617_v39, %v615_v5  ;;  %v652_v3 = vshrl.u32 %v651_v42, 5  ;;  %v662_v49 = vshll.u32 %v4195_v46, %v653_v0  ;;  %v4877_v25 = vshll.u32 %v647_v14, 8 }
 0x176   : > { %v3825_v55 = vmin.u32 %v1433_v10, %v4859_v7  ;;  %v658_v62 = vor.u32 %v657_v13, %v656_v17  ;;  %v661_v22 = vor.u32 %v660_v18, %v659_v15  ;;  %v665_v28 = vshll.u32 %v4196_v48, %v653_v0 }
 0x177   : > { %v619_v56 = vxor.u32 2147483648, %v618_v63  ;;  %v664_v29 = vor.u32 %v663_v47, %v662_v49  ;;  %v666_v12 = vshrl.u32 %v4197_v50, %v654_v52  ;;  %v668_v45 = vshll.u32 %v4197_v50, %v653_v0 }
 0x178   : > { %v1435_v21 = vclz %v3825_v55  ;;  %v669_v59 = vshrl.u32 %v4198_v57, %v654_v52  ;;  %v1454_v37 = vsel %vm1369_vm3, %v1453_v36, %v1429_v35  ;;  %v3828_v33 = vadd.s32 4294967169, %v1475_v61 }
 0x179   : > { %v620_v26 = vsel %vm537_vm7, %v619_v56, %v618_v63  ;;  %v667_v34 = vor.u32 %v666_v12, %v665_v28  ;;  %vm4892_vm4 = vcmp.le.f32.partialorder %v1367_v31, 0.7853982  ;;  %v655_v11 = vshrl.u32 %v4193_v40, %v654_v52 }
 0x17a   : > { %v623_v4 = vsel %vm4819_vm6, %v4608_v6, %v620_v26  ;;  %v3826_v30 = vadd.s32 4294967294, %v1435_v21  ;;  %v670_v16 = vor.u32 %v669_v59, %v668_v45  ;;  %vm671_vm2 = vcmp.lt.s32.totalorder %v652_v3, 1 }
 0x17b   : > { %4066 = vcosq.f32 %v623_v4  ;;  %vm672_vm6 = vcmp.lt.s32.totalorder %v652_v3, 2  ;;  %vm674_vm7 = vcmp.lt.s32.totalorder %v652_v3, 4  ;;  %v679_v1 = vsel %vm671_vm2, %v658_v62, %v661_v22 }
 0x17c   : > { %4068 = vsinq.f32 %v623_v4  ;;  %vm3827_vm5 = vcmp.lt.s32.totalorder %v3826_v30, 0  ;;  %v676_v35 = vsel %vm674_vm7, %v664_v29, 2102212464  ;;  %vm673_vm8 = vcmp.lt.s32.totalorder %v652_v3, 3 }
 0x17d   : > { %v1438_v24 = vsel %vm3827_vm5, 0, %v3826_v30  ;;  %v680_v54 = vsel %vm674_vm7, %v667_v34, 920167782  ;;  %v683_v19 = vsel %vm671_vm2, %v661_v22, %v664_v29  ;;  %v684_v60 = vsel %vm674_vm7, %v670_v16, 1326507024 }
 0x17e   : > { %v1439_v42 = vsub.s32 32, %v1438_v24  ;;  %v1443_v41 = vsub.s32 4294967266, %v1438_v24  ;;  %v1440_v31 = vshll.u32 %v4859_v7, %v1438_v24  ;;  %v681_v0 = vsel %vm673_vm8, %v664_v29, %v680_v54 }
 0x17f   : > { %v675_v38 = vsel %vm671_vm2, %v655_v11, %v658_v62  ;;  %v677_v52 = vsel %vm673_vm8, %v661_v22, %v676_v35  ;;  %v682_v32 = vsel %vm672_vm6, %v679_v1, %v681_v0  ;;  %v685_v5 = vsel %vm673_vm8, %v667_v34, %v684_v60 }
 0x180   : > { %v1441_v27 = vshrl.u32 %v1423_v8, %v1439_v42  ;;  %v1444_v43 = vadd.s32 127, %v1443_v41  ;;  %v686_v14 = vsel %vm672_vm6, %v683_v19, %v685_v5  ;;  %v1481_v63 = vadd.s32 1, %v3828_v33 }
 0x181   : > { %v4901_v13 = vmul.u32.u64.low %v4877_v25, %v686_v14  ;;  %v4902_v18 = vmul.u32.u64.high %v4877_v25, %v686_v14, %v4901_v13  ;;  %v4905_v47 = vmul.u32.u64.low %v4877_v25, %v682_v32  ;;  %v4906_v7 = vmul.u32.u64.high %v4877_v25, %v682_v32, %v4905_v47 }
 0x182   : > { %v1442_v39 = vor.u32 %v1441_v27, %v1440_v31  ;;  %v1445_v10 = vshll.u32 %v1444_v43, 23  ;;  %vm2307_vm9 = vcmp.lt.s32.totalorder %v4862_v23, 2  ;;  %vm2308_vm10 = vcmp.eq.s32.totalorder %v4862_v23, 0 }
 0x183   : > { %vm2311_vm11 = vcmp.eq.s32.totalorder %v4862_v23, 2  ;;  %vm1482_vm12 = vcmp.gt.s32.totalorder %v1481_v63, 0  ;;  %vm627_vm13 = vweird.f32 %v4608_v6  ;;  %v1456_v55 = vsel %vm4892_vm4, 0, %v1454_v37 }
 0x184   : > { %v1446_v8 = vor.u32 4788187, %v1445_v10  ;;  %v678_v17 = vsel %vm672_vm6, %v675_v38, %v677_v52  ;;  %v1471_v15 = vand.u32 2147483647, %v4853_v51  ;;  %v1483_v61 = vsel %vm1482_vm12, %v1481_v63, 0 }
 0x185   : > { %vm630_vm14 = vcmp.lt.s32.totalorder %v4865_v58, 2  ;;  %v1449_v36 = vcvt.s32.f32 %v1442_v39  ;;  %v1485_v49 = vand.u32 31, %v1483_v61  ;;  %vm631_vm15 = vcmp.eq.s32.totalorder %v4865_v58, 0 }
 0x186   : > { %v1447_v56 = vand.u32 2147483647, %v1446_v8  ;;  %vm634_vm0 = vcmp.eq.s32.totalorder %v4865_v58, 2  ;;  %vm696_vm1 = vc.u32 %v4902_v18, %v4905_v47  ;;  %v697_v21 = vadd.s32 1, %v4906_v7 }
 0x187   : > { %v1460_v22 = vadd.s32 3, %v1456_v55  ;;  %v694_v26 = vmul.u32 %v4877_v25, %v678_v17  ;;  %v1486_v29 = vsub.s32 32, %v1485_v49  ;;  %v1478_v30 = vand.u32 8388607, %v1471_v15 }
 0x188   : > { %v4067_v62 = vpop.eup %4066  ;;  %v1450_v3 = vmul.f32 %v1449_v36, %v1447_v56  ;;  %v698_v4 = vsel %vm696_vm1, %v697_v21, %v4906_v7  ;;  %v4927_v45 = vshrl.u32 %v1483_v61, 5  ;;  %v1488_v33 = vshll.u32 %v4193_v40, %v1485_v49 }
 0x189   : > { %v4069_v28 = vpop.eup %4068  ;;  %v635_v12 = vxor.u32 2147483648, %v4067_v62  ;;  %v699_v34 = vadd.s32 %v698_v4, %v694_v26  ;;  %v1489_v16 = vshrl.u32 %v4194_v44, %v1486_v29  ;;  %v1491_v24 = vshll.u32 %v4194_v44, %v1485_v49 }
 0x18a   : > { %v632_v59 = vxor.u32 2147483648, %v4069_v28  ;;  %v1451_v37 = vxor.u32 2147483648, %v1450_v3  ;;  %v1492_v31 = vshrl.u32 %v4195_v46, %v1486_v29  ;;  %v1495_v23 = vshrl.u32 %v4196_v48, %v1486_v29 }
 0x18b   : > { %v636_v11 = vsel %vm634_vm0, %v635_v12, %v4069_v28  ;;  %v2313_v25 = vsel %vm2311_vm11, %v635_v12, %v4069_v28  ;;  %v700_v1 = vadd.s32 536870912, %v699_v34  ;;  %v1497_v58 = vshll.u32 %v4196_v48, %v1485_v49 }
 0x18c   : > { %v633_v42 = vsel %vm631_vm15, %v4067_v62, %v632_v59  ;;  %v2310_v41 = vsel %vm2308_vm10, %v4067_v62, %v632_v59  ;;  %v1452_v35 = vsel %vm1369_vm3, %v1451_v37, %v1450_v3  ;;  %v1498_v2 = vshrl.u32 %v4197_v50, %v1486_v29  ;;  %v4980_v62 = vpop.f32.mrf.mxu0 }
 0x18d   : > { %v637_v54 = vsel %vm630_vm14, %v633_v42, %v636_v11  ;;  %v2314_v19 = vsel %vm2307_vm9, %v2310_v41, %v2313_v25  ;;  %v1455_v60 = vsel %vm4892_vm4, %v4635_v53, %v1452_v35  ;;  %v4954_v0 = vshrl.u32 %v700_v1, 30 }
 0x18e   : > { %v638_v27 = vsel %vm627_vm13, nan, %v637_v54  ;;  %v2315_v43 = vsel %vm627_vm13, nan, %v2314_v19  ;;  %4070 = vcosq.f32 %v1455_v60  ;;  %v1494_v52 = vshll.u32 %v4195_v46, %v1485_v49 }
 0x18f   : > { %1993 = vst [vmem:[%s4623_s28 + $0x10] sm:$0xff] %v638_v27  ;;  %3657 = vst [vmem:[%s4623_s28 + $0x90] sm:$0xff] %v2315_v43  ;;  %4072 = vsinq.f32 %v1455_v60  ;;  %v702_v38 = vshll.u32 %v4954_v0, 30  ;;  %v1500_v32 = vshll.u32 %v4197_v50, %v1485_v49  ;;  %v1501_v6 = vshrl.u32 %v4198_v57, %v1486_v29 }
 0x190   : > { %v4965_v5 = vand.u32 3, %v1456_v55  ;;  %v1490_v39 = vor.u32 %v1489_v16, %v1488_v33  ;;  %v1499_v10 = vor.u32 %v1498_v2, %v1497_v58  ;;  %v1493_v63 = vor.u32 %v1492_v31, %v1491_v24 }
 0x191   : > { %v4967_v14 = vsub.s32 %v699_v34, %v702_v38  ;;  %v1496_v13 = vor.u32 %v1495_v23, %v1494_v52  ;;  %v1502_v7 = vor.u32 %v1501_v6, %v1500_v32  ;;  %v1461_v8 = vand.u32 3, %v1460_v22 }
 0x192   : > { %v1479_v61 = vor.u32 8388608, %v1478_v30  ;;  %vm1506_vm3 = vcmp.lt.s32.totalorder %v4927_v45, 4  ;;  %vm3135_vm4 = vcmp.eq.s32.totalorder %v4965_v5, 2  ;;  %vm1503_vm5 = vcmp.lt.s32.totalorder %v4927_v45, 1 }
 0x193   : > { %v705_v17 = vsub.s32 0, %v4967_v14  ;;  %v1512_v56 = vsel %vm1506_vm3, %v1499_v10, 920167782  ;;  %v1516_v55 = vsel %vm1506_vm3, %v1502_v7, 1326507024  ;;  %vm3132_vm2 = vcmp.eq.s32.totalorder %v4965_v5, 0 }
 0x194   : > { %vm1505_vm6 = vcmp.lt.s32.totalorder %v4927_v45, 3  ;;  %v1511_v49 = vsel %vm1503_vm5, %v1490_v39, %v1493_v63  ;;  %v1515_v21 = vsel %vm1503_vm5, %v1493_v63, %v1496_v13  ;;  %vm3131_vm7 = vcmp.lt.s32.totalorder %v4965_v5, 2 }
 0x195   : > { %v3797_v36 = vmin.u32 %v705_v17, %v4967_v14  ;;  %v1487_v3 = vshrl.u32 %v4193_v40, %v1486_v29  ;;  %v1508_v22 = vsel %vm1506_vm3, %v1496_v13, 2102212464  ;;  %v1513_v26 = vsel %vm1505_vm6, %v1496_v13, %v1512_v56 }
 0x196   : > { %v1517_v28 = vsel %vm1505_vm6, %v1499_v10, %v1516_v55  ;;  %vm1459_vm8 = vweird.f32 %v4635_v53  ;;  %vm1462_vm9 = vcmp.lt.s32.totalorder %v1461_v8, 2  ;;  %vm1504_vm10 = vcmp.lt.s32.totalorder %v4927_v45, 2  ;;  %v5035_v55 = vpop.f32.mrf.mxu1 }
 0x197   : > { %v707_v12 = vclz %v3797_v36  ;;  %v1519_v4 = vshll.u32 %v1479_v61, 8  ;;  %v1507_v30 = vsel %vm1503_vm5, %v1487_v3, %v1490_v39  ;;  %v1514_v29 = vsel %vm1504_vm10, %v1511_v49, %v1513_v26 }
 0x198   : > { %v1518_v59 = vsel %vm1504_vm10, %v1515_v21, %v1517_v28  ;;  %v746_v37 = vand.u32 2139095040, %v4980_v62  ;;  %v1509_v33 = vsel %vm1505_vm6, %v1493_v63, %v1508_v22  ;;  %vm1463_vm11 = vcmp.eq.s32.totalorder %v1461_v8, 0 }
 0x199   : > { %v3798_v34 = vadd.s32 4294967294, %v707_v12  ;;  %v4999_v11 = vmul.u32.u64.low %v1519_v4, %v1518_v59  ;;  %v5000_v25 = vmul.u32.u64.high %v1519_v4, %v1518_v59, %v4999_v11  ;;  %vm1466_vm12 = vcmp.eq.s32.totalorder %v1461_v8, 2 }
 0x19a   : > { %v5002_v24 = vmul.u32.u64.low %v1519_v4, %v1514_v29  ;;  %v5003_v42 = vmul.u32.u64.high %v1519_v4, %v1514_v29, %v5002_v24  ;;  %v747_v41 = vshrl.u32 %v746_v37, 23  ;;  %v695_v54 = vadd.s32 %v4905_v47, %v4902_v18 }
 0x19b   : > { %v4071_v16 = vpop.eup %4070  ;;  %vm3799_vm13 = vcmp.lt.s32.totalorder %v3798_v34, 0  ;;  %v725_v31 = vsub.s32 4, %v4954_v0  ;;  %v1510_v27 = vsel %vm1504_vm10, %v1507_v30, %v1509_v33  ;;  %v743_v7 = vand.u32 2147483647, %v4980_v62 }
 0x19c   : > { %v4073_v35 = vpop.eup %4072  ;;  %v1467_v1 = vxor.u32 2147483648, %v4071_v16  ;;  %v710_v60 = vsel %vm3799_vm13, 0, %v3798_v34  ;;  %v3800_v2 = vadd.s32 4294967169, %v747_v41  ;;  %vm1528_vm14 = vc.u32 %v5000_v25, %v5002_v24 }
 0x19d   : > { %v1464_v19 = vxor.u32 2147483648, %v4073_v35  ;;  %v711_v58 = vsub.s32 32, %v710_v60  ;;  %v712_v47 = vshll.u32 %v4967_v14, %v710_v60  ;;  %v715_v52 = vsub.s32 4294967266, %v710_v60 }
 0x19e   : > { %v1468_v43 = vsel %vm1466_vm12, %v1467_v1, %v4073_v35  ;;  %v3137_v23 = vsel %vm3135_vm4, %v1467_v1, %v4073_v35  ;;  %v1529_v13 = vadd.s32 1, %v5003_v42  ;;  %v1526_v14 = vmul.u32 %v1519_v4, %v1510_v27 }
 0x19f   : > { %v1465_v38 = vsel %vm1463_vm11, %v4071_v16, %v1464_v19  ;;  %v3134_v18 = vsel %vm3132_vm2, %v4071_v16, %v1464_v19  ;;  %v713_v6 = vshrl.u32 %v695_v54, %v711_v58  ;;  %v716_v63 = vadd.s32 127, %v715_v52 }
 0x1a0   : > { %v1469_v32 = vsel %vm1462_vm9, %v1465_v38, %v1468_v43  ;;  %v3138_v45 = vsel %vm3131_vm7, %v3134_v18, %v3137_v23  ;;  %v753_v5 = vadd.s32 1, %v3800_v2  ;;  %vm641_vm15 = vcmp.lt.s32.totalorder %v4809_v20, 0 }
 0x1a1   : > { %v1470_v39 = vsel %vm1459_vm8, nan, %v1469_v32  ;;  %v3139_v10 = vsel %vm1459_vm8, nan, %v3138_v45  ;;  %v714_v8 = vor.u32 %v713_v6, %v712_v47  ;;  %v717_v17 = vshll.u32 %v716_v63, 23 }
 0x1a2   : > { %2001 = vst [vmem:[%s4623_s28 + $0x50] sm:$0xff] %v1470_v39  ;;  %3665 = vst [vmem:[%s4623_s28 + $0xd0] sm:$0xff] %v3139_v10  ;;  %v1530_v61 = vsel %vm1528_vm14, %v1529_v13, %v5003_v42  ;;  %v726_v53 = vsel %vm641_vm15, %v725_v31, %v4954_v0  ;;  %vm754_vm0 = vcmp.gt.s32.totalorder %v753_v5, 0  ;;  %vm5039_vm1 = vcmp.le.f32.partialorder %v639_v9, 0.7853982 }
 0x1a3   : > { %v1531_v56 = vadd.s32 %v1530_v61, %v1526_v14  ;;  %v718_v36 = vor.u32 4788187, %v717_v17  ;;  %v755_v49 = vsel %vm754_vm0, %v753_v5, 0  ;;  %v750_v22 = vand.u32 8388607, %v743_v7 }
 0x1a4   : > { %v757_v26 = vand.u32 31, %v755_v49  ;;  %v721_v12 = vcvt.s32.f32 %v714_v8  ;;  %v728_v0 = vsel %vm5039_vm1, 0, %v726_v53  ;;  %v1578_v4 = vand.u32 2139095040, %v5035_v55 }
 0x1a5   : > { %v1532_v3 = vadd.s32 536870912, %v1531_v56  ;;  %v719_v28 = vand.u32 2147483647, %v718_v36  ;;  %v732_v9 = vadd.s32 3, %v728_v0  ;;  %v5050_v37 = vand.u32 3, %v728_v0 }
 0x1a6   : > { %v758_v29 = vsub.s32 32, %v757_v26  ;;  %v751_v33 = vor.u32 8388608, %v750_v22  ;;  %v1579_v41 = vshrl.u32 %v1578_v4, 23  ;;  %v756_v1 = vshrl.u32 %v755_v49, 5 }
 0x1a7   : > { %v5048_v30 = vshrl.u32 %v1532_v3, 30  ;;  %v722_v59 = vmul.f32 %v721_v12, %v719_v28  ;;  %v760_v31 = vshll.u32 %v4193_v40, %v757_v26  ;;  %v763_v27 = vshll.u32 %v4194_v44, %v757_v26 }
 0x1a8   : > { %v761_v16 = vshrl.u32 %v4194_v44, %v758_v29  ;;  %v764_v42 = vshrl.u32 %v4195_v46, %v758_v29  ;;  %v767_v54 = vshrl.u32 %v4196_v48, %v758_v29  ;;  %v770_v19 = vshrl.u32 %v4197_v50, %v758_v29 }
 0x1a9   : > { %v1534_v34 = vshll.u32 %v5048_v30, 30  ;;  %v723_v11 = vxor.u32 2147483648, %v722_v59  ;;  %v773_v43 = vshrl.u32 %v4198_v57, %v758_v29  ;;  %v766_v2 = vshll.u32 %v4195_v46, %v757_v26 }
 0x1aa   : > { %v769_v38 = vshll.u32 %v4196_v48, %v757_v26  ;;  %v762_v18 = vor.u32 %v761_v16, %v760_v31  ;;  %v765_v47 = vor.u32 %v764_v42, %v763_v27  ;;  %v772_v52 = vshll.u32 %v4197_v50, %v757_v26 }
 0x1ab   : > { %v5055_v35 = vsub.s32 %v1531_v56, %v1534_v34  ;;  %v724_v60 = vsel %vm641_vm15, %v723_v11, %v722_v59  ;;  %v768_v45 = vor.u32 %v767_v54, %v766_v2  ;;  %v5072_v39 = vand.u32 3, %v732_v9 }
 0x1ac   : > { %v727_v23 = vsel %vm5039_vm1, %v4809_v20, %v724_v60  ;;  %v771_v6 = vor.u32 %v770_v19, %v769_v38  ;;  %v774_v10 = vor.u32 %v773_v43, %v772_v52  ;;  %v5074_v63 = vshll.u32 %v751_v33, 8 }
 0x1ad   : > { %v1537_v58 = vsub.s32 0, %v5055_v35  ;;  %4074 = vcosq.f32 %v727_v23  ;;  %v3832_v13 = vadd.s32 4294967169, %v1579_v41  ;;  %vm1473_vm3 = vcmp.lt.s32.totalorder %v4853_v51, 0 }
 0x1ae   : > { %4076 = vsinq.f32 %v727_v23  ;;  %v1557_v5 = vsub.s32 4, %v5048_v30  ;;  %v759_v8 = vshrl.u32 %v4193_v40, %v758_v29  ;;  %vm775_vm4 = vcmp.lt.s32.totalorder %v756_v1, 1 }
 0x1af   : > { %v3829_v32 = vmin.u32 %v1537_v58, %v5055_v35  ;;  %vm776_vm5 = vcmp.lt.s32.totalorder %v756_v1, 2  ;;  %vm777_vm2 = vcmp.lt.s32.totalorder %v756_v1, 3  ;;  %vm778_vm6 = vcmp.lt.s32.totalorder %v756_v1, 4 }
 0x1b0   : > { %v783_v17 = vsel %vm775_vm4, %v762_v18, %v765_v47  ;;  %v780_v53 = vsel %vm778_vm6, %v768_v45, 2102212464  ;;  %v784_v56 = vsel %vm778_vm6, %v771_v6, 920167782  ;;  %v787_v36 = vsel %vm775_vm4, %v765_v47, %v768_v45 }
 0x1b1   : > { %v1539_v14 = vclz %v3829_v32  ;;  %vm5081_vm7 = vcmp.le.f32.partialorder %v1471_v15, 0.7853982  ;;  %v779_v21 = vsel %vm775_vm4, %v759_v8, %v762_v18  ;;  %v785_v3 = vsel %vm777_vm2, %v768_v45, %v784_v56 }
 0x1b2   : > { %v788_v22 = vsel %vm778_vm6, %v774_v10, 1326507024  ;;  %v1585_v26 = vadd.s32 1, %v3832_v13  ;;  %vm2414_vm8 = vcmp.eq.s32.totalorder %v5050_v37, 2  ;;  %v781_v28 = vsel %vm777_vm2, %v765_v47, %v780_v53  ;;  %v5133_v53 = vpop.f32.mrf.mxu0 }
 0x1b3   : > { %v3830_v61 = vadd.s32 4294967294, %v1539_v14  ;;  %v786_v12 = vsel %vm776_vm5, %v783_v17, %v785_v3  ;;  %v789_v0 = vsel %vm777_vm2, %v771_v6, %v788_v22  ;;  %vm2411_vm10 = vcmp.eq.s32.totalorder %v5050_v37, 0 }
 0x1b4   : > { %v790_v4 = vsel %vm776_vm5, %v787_v36, %v789_v0  ;;  %v5093_v29 = vmul.u32.u64.low %v5074_v63, %v786_v12  ;;  %v5094_v59 = vmul.u32.u64.high %v5074_v63, %v786_v12, %v5093_v29  ;;  %vm2410_vm11 = vcmp.lt.s32.totalorder %v5050_v37, 2 }
 0x1b5   : > { %vm3831_vm9 = vcmp.lt.s32.totalorder %v3830_v61, 0  ;;  %v1527_v9 = vadd.s32 %v5002_v24, %v5000_v25  ;;  %v1575_v11 = vand.u32 2147483647, %v5035_v55  ;;  %v782_v16 = vsel %vm776_vm5, %v779_v21, %v781_v28 }
 0x1b6   : > { %v1542_v15 = vsel %vm3831_vm9, 0, %v3830_v61  ;;  %v5103_v42 = vmul.u32.u64.low %v5074_v63, %v790_v4  ;;  %v5104_v41 = vmul.u32.u64.high %v5074_v63, %v790_v4, %v5103_v42  ;;  %vm1586_vm12 = vcmp.gt.s32.totalorder %v1585_v26, 0 }
 0x1b7   : > { %v1543_v34 = vsub.s32 32, %v1542_v15  ;;  %v1547_v33 = vsub.s32 4294967266, %v1542_v15  ;;  %v1544_v54 = vshll.u32 %v5055_v35, %v1542_v15  ;;  %v1587_v31 = vsel %vm1586_vm12, %v1585_v26, 0 }
 0x1b8   : > { %vm734_vm13 = vcmp.lt.s32.totalorder %v5072_v39, 2  ;;  %v1558_v25 = vsel %vm1473_vm3, %v1557_v5, %v5048_v30  ;;  %v801_v24 = vadd.s32 1, %v5094_v59  ;;  %v1589_v1 = vand.u32 31, %v1587_v31 }
 0x1b9   : > { %v1545_v19 = vshrl.u32 %v1527_v9, %v1543_v34  ;;  %v1548_v60 = vadd.s32 127, %v1547_v33  ;;  %vm735_vm14 = vcmp.eq.s32.totalorder %v5072_v39, 0  ;;  %vm738_vm15 = vcmp.eq.s32.totalorder %v5072_v39, 2 }
 0x1ba   : > { %v4075_v27 = vpop.eup %4074  ;;  %v798_v2 = vmul.u32 %v5074_v63, %v782_v16  ;;  %vm800_vm0 = vc.u32 %v5104_v41, %v5093_v29  ;;  %v1582_v30 = vand.u32 8388607, %v1575_v11  ;;  %v1560_v47 = vsel %vm5081_vm7, 0, %v1558_v25 }
 0x1bb   : > { %v1546_v43 = vor.u32 %v1545_v19, %v1544_v54  ;;  %v1549_v23 = vshll.u32 %v1548_v60, 23  ;;  %v4077_v35 = vpop.eup %4076  ;;  %v739_v58 = vxor.u32 2147483648, %v4075_v27  ;;  %v802_v52 = vsel %vm800_vm0, %v801_v24, %v5094_v59 }
 0x1bc   : > { %v736_v38 = vxor.u32 2147483648, %v4077_v35  ;;  %v803_v6 = vadd.s32 %v802_v52, %v798_v2  ;;  %v1590_v10 = vsub.s32 32, %v1589_v1  ;;  %vm731_vm1 = vweird.f32 %v4809_v20 }
 0x1bd   : > { %v1550_v18 = vor.u32 4788187, %v1549_v23  ;;  %v740_v32 = vsel %vm738_vm15, %v739_v58, %v4077_v35  ;;  %v2416_v45 = vsel %vm2414_vm8, %v739_v58, %v4077_v35  ;;  %v1553_v5 = vcvt.s32.f32 %v1546_v43 }
 0x1be   : > { %v737_v63 = vsel %vm735_vm14, %v4075_v27, %v736_v38  ;;  %v2413_v13 = vsel %vm2411_vm10, %v4075_v27, %v736_v38  ;;  %v804_v61 = vadd.s32 536870912, %v803_v6  ;;  %v1583_v3 = vor.u32 8388608, %v1582_v30 }
 0x1bf   : > { %v1551_v14 = vand.u32 2147483647, %v1550_v18  ;;  %v741_v8 = vsel %vm734_vm13, %v737_v63, %v740_v32  ;;  %v2417_v17 = vsel %vm2410_vm11, %v2413_v13, %v2416_v45  ;;  %v1564_v22 = vadd.s32 3, %v1560_v47 }
 0x1c0   : > { %v742_v56 = vsel %vm731_vm1, nan, %v741_v8  ;;  %v2418_v36 = vsel %vm731_vm1, nan, %v2417_v17  ;;  %v5137_v26 = vshrl.u32 %v804_v61, 30  ;;  %v1593_v20 = vshrl.u32 %v4194_v44, %v1590_v10 }
 0x1c1   : > { %v1554_v21 = vmul.f32 %v1553_v5, %v1551_v14  ;;  %1994 = vst [vmem:[%s4623_s28 + $0x18] sm:$0xff] %v742_v56  ;;  %3658 = vst [vmem:[%s4623_s28 + $0x98] sm:$0xff] %v2418_v36  ;;  %v1596_v39 = vshrl.u32 %v4195_v46, %v1590_v10  ;;  %v1599_v37 = vshrl.u32 %v4196_v48, %v1590_v10  ;;  %v850_v0 = vand.u32 2139095040, %v5133_v53 }
 0x1c2   : > { %v1602_v12 = vshrl.u32 %v4197_v50, %v1590_v10  ;;  %v806_v15 = vshll.u32 %v5137_v26, 30  ;;  %v1588_v4 = vshrl.u32 %v1587_v31, 5  ;;  %v1592_v59 = vshll.u32 %v4193_v40, %v1589_v1 }
 0x1c3   : > { %v1555_v28 = vxor.u32 2147483648, %v1554_v21  ;;  %v1595_v9 = vshll.u32 %v4194_v44, %v1589_v1  ;;  %v1598_v33 = vshll.u32 %v4195_v46, %v1589_v1  ;;  %v1601_v16 = vshll.u32 %v4196_v48, %v1589_v1 }
 0x1c4   : > { %v1605_v42 = vshrl.u32 %v4198_v57, %v1590_v10  ;;  %v5155_v19 = vsub.s32 %v803_v6, %v806_v15  ;;  %v1594_v60 = vor.u32 %v1593_v20, %v1592_v59  ;;  %v1604_v27 = vshll.u32 %v4197_v50, %v1589_v1 }
 0x1c5   : > { %v1556_v34 = vsel %vm1473_vm3, %v1555_v28, %v1554_v21  ;;  %v1597_v31 = vor.u32 %v1596_v39, %v1595_v9  ;;  %v1600_v25 = vor.u32 %v1599_v37, %v1598_v33  ;;  %v1603_v24 = vor.u32 %v1602_v12, %v1601_v16 }
 0x1c6   : > { %v1559_v54 = vsel %vm5081_vm7, %v4853_v51, %v1556_v34  ;;  %v809_v43 = vsub.s32 0, %v5155_v19  ;;  %v5159_v23 = vshll.u32 %v1583_v3, 8  ;;  %v5161_v35 = vand.u32 3, %v1564_v22 }
 0x1c7   : > { %4078 = vcosq.f32 %v1559_v54  ;;  %v5163_v58 = vand.u32 3, %v1560_v47  ;;  %v1606_v49 = vor.u32 %v1605_v42, %v1604_v27  ;;  %v851_v2 = vshrl.u32 %v850_v0, 23 }
 0x1c8   : > { %4080 = vsinq.f32 %v1559_v54  ;;  %v3801_v30 = vmin.u32 %v809_v43, %v5155_v19  ;;  %v1591_v38 = vshrl.u32 %v4193_v40, %v1590_v10  ;;  %vm1607_vm3 = vcmp.lt.s32.totalorder %v1588_v4, 1 }
 0x1c9   : > { %vm1610_vm4 = vcmp.lt.s32.totalorder %v1588_v4, 4  ;;  %vm1608_vm5 = vcmp.lt.s32.totalorder %v1588_v4, 2  ;;  %v1615_v1 = vsel %vm1607_vm3, %v1594_v60, %v1597_v31  ;;  %vm745_vm2 = vcmp.lt.s32.totalorder %v4980_v62, 0 }
 0x1ca   : > { %v1612_v18 = vsel %vm1610_vm4, %v1600_v25, 2102212464  ;;  %v1616_v52 = vsel %vm1610_vm4, %v1603_v24, 920167782  ;;  %v811_v32 = vclz %v3801_v30  ;;  %vm1609_vm6 = vcmp.lt.s32.totalorder %v1588_v4, 3 }
 0x1cb   : > { %v1611_v45 = vsel %vm1607_vm3, %v1591_v38, %v1594_v60  ;;  %v1619_v6 = vsel %vm1607_vm3, %v1597_v31, %v1600_v25  ;;  %v1613_v47 = vsel %vm1609_vm6, %v1597_v31, %v1612_v18  ;;  %v1617_v63 = vsel %vm1609_vm6, %v1600_v25, %v1616_v52 }
 0x1cc   : > { %v1620_v13 = vsel %vm1610_vm4, %v1606_v49, 1326507024  ;;  %v3804_v14 = vadd.s32 4294967169, %v851_v2  ;;  %v3802_v5 = vadd.s32 4294967294, %v811_v32  ;;  %v1618_v8 = vsel %vm1608_vm5, %v1615_v1, %v1617_v63 }
 0x1cd   : > { %v1621_v10 = vsel %vm1609_vm6, %v1603_v24, %v1620_v13  ;;  %v847_v17 = vand.u32 2147483647, %v5133_v53  ;;  %vm3235_vm7 = vcmp.eq.s32.totalorder %v5163_v58, 0  ;;  %vm5173_vm8 = vcmp.le.f32.partialorder %v743_v7, 0.7853982 }
 0x1ce   : > { %v1614_v56 = vsel %vm1608_vm5, %v1611_v45, %v1613_v47  ;;  %v1622_v36 = vsel %vm1608_vm5, %v1619_v6, %v1621_v10  ;;  %v5180_v21 = vmul.u32.u64.low %v5159_v23, %v1618_v8  ;;  %v5181_v3 = vmul.u32.u64.high %v5159_v23, %v1618_v8, %v5180_v21 }
 0x1cf   : > { %vm3234_vm9 = vcmp.lt.s32.totalorder %v5163_v58, 2  ;;  %vm3803_vm10 = vcmp.lt.s32.totalorder %v3802_v5, 0  ;;  %v5186_v22 = vmul.u32.u64.low %v5159_v23, %v1622_v36  ;;  %v5187_v20 = vmul.u32.u64.high %v5159_v23, %v1622_v36, %v5186_v22 }
 0x1d0   : > { %v857_v7 = vadd.s32 1, %v3804_v14  ;;  %vm1563_vm11 = vweird.f32 %v4853_v51  ;;  %vm1566_vm12 = vcmp.lt.s32.totalorder %v5161_v35, 2  ;;  %vm3238_vm13 = vcmp.eq.s32.totalorder %v5163_v58, 2 }
 0x1d1   : > { %v814_v39 = vsel %vm3803_vm10, 0, %v3802_v5  ;;  %v829_v28 = vsub.s32 4, %v5137_v26  ;;  %v799_v37 = vadd.s32 %v5093_v29, %v5104_v41  ;;  %vm1570_vm15 = vcmp.eq.s32.totalorder %v5161_v35, 2 }
 0x1d2   : > { %v815_v12 = vsub.s32 32, %v814_v39  ;;  %v819_v0 = vsub.s32 4294967266, %v814_v39  ;;  %vm858_vm14 = vcmp.gt.s32.totalorder %v857_v7, 0  ;;  %v1630_v15 = vmul.u32 %v5159_v23, %v1614_v56 }
 0x1d3   : > { %v1633_v4 = vadd.s32 1, %v5181_v3  ;;  %v859_v59 = vsel %vm858_vm14, %v857_v7, 0  ;;  %v816_v34 = vshll.u32 %v5155_v19, %v814_v39  ;;  %vm1632_vm0 = vc.u32 %v5187_v20, %v5180_v21 }
 0x1d4   : > { %v4079_v9 = vpop.eup %4078  ;;  %v817_v33 = vshrl.u32 %v799_v37, %v815_v12  ;;  %v820_v16 = vadd.s32 127, %v819_v0  ;;  %v830_v41 = vsel %vm745_vm2, %v829_v28, %v5137_v26  ;;  %v861_v60 = vand.u32 31, %v859_v59 }
 0x1d5   : > { %v4081_v42 = vpop.eup %4080  ;;  %v1571_v29 = vxor.u32 2147483648, %v4079_v9  ;;  %v1634_v54 = vsel %vm1632_vm0, %v1633_v4, %v5181_v3  ;;  %vm1567_vm1 = vcmp.eq.s32.totalorder %v5161_v35, 0  ;;  %v854_v26 = vand.u32 8388607, %v847_v17 }
 0x1d6   : > { %v1568_v31 = vxor.u32 2147483648, %v4081_v42  ;;  %v818_v25 = vor.u32 %v817_v33, %v816_v34  ;;  %v821_v24 = vshll.u32 %v820_v16, 23  ;;  %v1635_v27 = vadd.s32 %v1634_v54, %v1630_v15  ;;  %v5249_v33 = vpop.f32.mrf.mxu1 }
 0x1d7   : > { %v1572_v19 = vsel %vm1570_vm15, %v1571_v29, %v4081_v42  ;;  %v3240_v43 = vsel %vm3238_vm13, %v1571_v29, %v4081_v42  ;;  %v832_v30 = vsel %vm5173_vm8, 0, %v830_v41  ;;  %v862_v52 = vsub.s32 32, %v861_v60 }
 0x1d8   : > { %v1569_v23 = vsel %vm1567_vm1, %v4079_v9, %v1568_v31  ;;  %v3237_v49 = vsel %vm3235_vm7, %v4079_v9, %v1568_v31  ;;  %v822_v2 = vor.u32 4788187, %v821_v24  ;;  %v1636_v1 = vadd.s32 536870912, %v1635_v27 }
 0x1d9   : > { %v1573_v38 = vsel %vm1566_vm12, %v1569_v23, %v1572_v19  ;;  %v3241_v18 = vsel %vm3234_vm9, %v3237_v49, %v3240_v43  ;;  %v825_v47 = vcvt.s32.f32 %v818_v25  ;;  %v836_v35 = vadd.s32 3, %v832_v30 }
 0x1da   : > { %v1574_v32 = vsel %vm1563_vm11, nan, %v1573_v38  ;;  %v3242_v45 = vsel %vm1563_vm11, nan, %v3241_v18  ;;  %v823_v6 = vand.u32 2147483647, %v822_v2  ;;  %v5226_v63 = vshrl.u32 %v1636_v1, 30 }
 0x1db   : > { %2002 = vst [vmem:[%s4623_s28 + $0x58] sm:$0xff] %v1574_v32  ;;  %3666 = vst [vmem:[%s4623_s28 + $0xd8] sm:$0xff] %v3242_v45  ;;  %v855_v14 = vor.u32 8388608, %v854_v26  ;;  %v5228_v5 = vand.u32 3, %v832_v30  ;;  %v865_v8 = vshrl.u32 %v4194_v44, %v862_v52  ;;  %v868_v10 = vshrl.u32 %v4195_v46, %v862_v52 }
 0x1dc   : > { %v826_v13 = vmul.f32 %v825_v47, %v823_v6  ;;  %v1638_v58 = vshll.u32 %v5226_v63, 30  ;;  %v871_v51 = vshrl.u32 %v4196_v48, %v862_v52  ;;  %v874_v36 = vshrl.u32 %v4197_v50, %v862_v52 }
 0x1dd   : > { %v877_v3 = vshrl.u32 %v4198_v57, %v862_v52  ;;  %v860_v7 = vshrl.u32 %v859_v59, 5  ;;  %v864_v39 = vshll.u32 %v4193_v40, %v861_v60  ;;  %v867_v28 = vshll.u32 %v4194_v44, %v861_v60 }
 0x1de   : > { %v827_v56 = vxor.u32 2147483648, %v826_v13  ;;  %v5236_v22 = vsub.s32 %v1635_v27, %v1638_v58  ;;  %v870_v12 = vshll.u32 %v4195_v46, %v861_v60  ;;  %v873_v0 = vshll.u32 %v4196_v48, %v861_v60 }
 0x1df   : > { %v876_v15 = vshll.u32 %v4197_v50, %v861_v60  ;;  %v866_v59 = vor.u32 %v865_v8, %v864_v39  ;;  %v869_v34 = vor.u32 %v868_v10, %v867_v28  ;;  %v5251_v41 = vand.u32 3, %v836_v35 }
 0x1e0   : > { %v828_v37 = vsel %vm745_vm2, %v827_v56, %v826_v13  ;;  %v1641_v9 = vsub.s32 0, %v5236_v22  ;;  %v872_v16 = vor.u32 %v871_v51, %v870_v12  ;;  %v875_v42 = vor.u32 %v874_v36, %v873_v0 }
 0x1e1   : > { %v831_v4 = vsel %vm5173_vm8, %v4980_v62, %v828_v37  ;;  %v878_v29 = vor.u32 %v877_v3, %v876_v15  ;;  %vm1577_vm3 = vcmp.lt.s32.totalorder %v5035_v55, 0  ;;  %v895_v60 = vshll.u32 %v855_v14, 8 }
 0x1e2   : > { %4082 = vcosq.f32 %v831_v4  ;;  %v3833_v54 = vmin.u32 %v1641_v9, %v5236_v22  ;;  %v1661_v61 = vsub.s32 4, %v5226_v63  ;;  %v863_v31 = vshrl.u32 %v4193_v40, %v862_v52 }
 0x1e3   : > { %4084 = vsinq.f32 %v831_v4  ;;  %vm879_vm4 = vcmp.lt.s32.totalorder %v860_v7, 1  ;;  %v1682_v25 = vand.u32 2139095040, %v5249_v33  ;;  %vm881_vm5 = vcmp.lt.s32.totalorder %v860_v7, 3 }
 0x1e4   : > { %v1643_v24 = vclz %v3833_v54  ;;  %vm882_vm2 = vcmp.lt.s32.totalorder %v860_v7, 4  ;;  %v887_v27 = vsel %vm879_vm4, %v866_v59, %v869_v34  ;;  %v891_v26 = vsel %vm879_vm4, %v869_v34, %v872_v16 }
 0x1e5   : > { %v884_v19 = vsel %vm882_vm2, %v872_v16, 2102212464  ;;  %v888_v43 = vsel %vm882_vm2, %v875_v42, 920167782  ;;  %v892_v23 = vsel %vm882_vm2, %v878_v29, 1326507024  ;;  %v883_v18 = vsel %vm879_vm4, %v863_v31, %v866_v59 }
 0x1e6   : > { %vm5260_vm6 = vcmp.le.f32.partialorder %v1575_v11, 0.7853982  ;;  %v3834_v2 = vadd.s32 4294967294, %v1643_v24  ;;  %vm880_vm7 = vcmp.lt.s32.totalorder %v860_v7, 2  ;;  %v889_v30 = vsel %vm881_vm5, %v872_v16, %v888_v43 }
 0x1e7   : > { %v893_v38 = vsel %vm881_vm5, %v875_v42, %v892_v23  ;;  %v890_v1 = vsel %vm880_vm7, %v887_v27, %v889_v30  ;;  %v1683_v32 = vshrl.u32 %v1682_v25, 23  ;;  %vm2517_vm8 = vcmp.eq.s32.totalorder %v5228_v5, 2 }
 0x1e8   : > { %v894_v52 = vsel %vm880_vm7, %v891_v26, %v893_v38  ;;  %vm3835_vm9 = vcmp.lt.s32.totalorder %v3834_v2, 0  ;;  %v885_v11 = vsel %vm881_vm5, %v869_v34, %v884_v19  ;;  %vm2514_vm10 = vcmp.eq.s32.totalorder %v5228_v5, 0 }
 0x1e9   : > { %v5270_v45 = vmul.u32.u64.low %v895_v60, %v894_v52  ;;  %v5271_v6 = vmul.u32.u64.high %v895_v60, %v894_v52, %v5270_v45  ;;  %v1646_v47 = vsel %vm3835_vm9, 0, %v3834_v2  ;;  %v3836_v14 = vadd.s32 4294967169, %v1683_v32 }
 0x1ea   : > { %v5274_v13 = vmul.u32.u64.low %v895_v60, %v890_v1  ;;  %v5275_v35 = vmul.u32.u64.high %v895_v60, %v890_v1, %v5274_v13  ;;  %vm838_vm11 = vcmp.lt.s32.totalorder %v5251_v41, 2  ;;  %vm2513_vm12 = vcmp.lt.s32.totalorder %v5228_v5, 2 }
 0x1eb   : > { %v1631_v58 = vadd.s32 %v5180_v21, %v5187_v20  ;;  %v1647_v8 = vsub.s32 32, %v1646_v47  ;;  %v1651_v10 = vsub.s32 4294967266, %v1646_v47  ;;  %v1662_v56 = vsel %vm1577_vm3, %v1661_v61, %v5226_v63 }
 0x1ec   : > { %v886_v51 = vsel %vm880_vm7, %v883_v18, %v885_v11  ;;  %v1679_v36 = vand.u32 2147483647, %v5249_v33  ;;  %v1689_v3 = vadd.s32 1, %v3836_v14  ;;  %v1648_v39 = vshll.u32 %v5236_v22, %v1646_v47 }
 0x1ed   : > { %v1649_v28 = vshrl.u32 %v1631_v58, %v1647_v8  ;;  %v1652_v37 = vadd.s32 127, %v1651_v10  ;;  %vm904_vm13 = vc.u32 %v5271_v6, %v5274_v13  ;;  %vm839_vm14 = vcmp.eq.s32.totalorder %v5251_v41, 0 }
 0x1ee   : > { %vm842_vm15 = vcmp.eq.s32.totalorder %v5251_v41, 2  ;;  %v905_v21 = vadd.s32 1, %v5275_v35  ;;  %vm1690_vm0 = vcmp.gt.s32.totalorder %v1689_v3, 0  ;;  %v902_v12 = vmul.u32 %v895_v60, %v886_v51 }
 0x1ef   : > { %v4083_v20 = vpop.eup %4082  ;;  %v1650_v63 = vor.u32 %v1649_v28, %v1648_v39  ;;  %v1653_v7 = vshll.u32 %v1652_v37, 23  ;;  %v1691_v0 = vsel %vm1690_vm0, %v1689_v3, 0  ;;  %v1664_v22 = vsel %vm5260_vm6, 0, %v1662_v56 }
 0x1f0   : > { %v4085_v15 = vpop.eup %4084  ;;  %v843_v4 = vxor.u32 2147483648, %v4083_v20  ;;  %v906_v9 = vsel %vm904_vm13, %v905_v21, %v5275_v35  ;;  %v1693_v59 = vand.u32 31, %v1691_v0  ;;  %v1686_v29 = vand.u32 8388607, %v1679_v36  ;;  %v5336_v21 = vpop.f32.mrf.mxu0 }
 0x1f1   : > { %v840_v34 = vxor.u32 2147483648, %v4085_v15  ;;  %v1654_v16 = vor.u32 4788187, %v1653_v7  ;;  %v907_v42 = vadd.s32 %v906_v9, %v902_v12  ;;  %v1657_v61 = vcvt.s32.f32 %v1650_v63 }
 0x1f2   : > { %v844_v54 = vsel %vm842_vm15, %v843_v4, %v4085_v15  ;;  %v2519_v60 = vsel %vm2517_vm8, %v843_v4, %v4085_v15  ;;  %v1694_v31 = vsub.s32 32, %v1693_v59  ;;  %vm835_vm1 = vweird.f32 %v4980_v62 }
 0x1f3   : > { %v841_v25 = vsel %vm839_vm14, %v4083_v20, %v840_v34  ;;  %v2516_v24 = vsel %vm2514_vm10, %v4083_v20, %v840_v34  ;;  %v1655_v27 = vand.u32 2147483647, %v1654_v16  ;;  %v908_v19 = vadd.s32 536870912, %v907_v42 }
 0x1f4   : > { %v845_v43 = vsel %vm838_vm11, %v841_v25, %v844_v54  ;;  %v2520_v26 = vsel %vm2513_vm12, %v2516_v24, %v2519_v60  ;;  %v1668_v18 = vadd.s32 3, %v1664_v22  ;;  %v5315_v1 = vand.u32 3, %v1664_v22 }
 0x1f5   : > { %v846_v23 = vsel %vm835_vm1, nan, %v845_v43  ;;  %v2521_v2 = vsel %vm835_vm1, nan, %v2520_v26  ;;  %v1658_v30 = vmul.f32 %v1657_v61, %v1655_v27  ;;  %v5311_v38 = vshrl.u32 %v908_v19, 30 }
 0x1f6   : > { %1995 = vst [vmem:[%s4623_s28 + $0x20] sm:$0xff] %v846_v23  ;;  %3659 = vst [vmem:[%s4623_s28 + $0xa0] sm:$0xff] %v2521_v2  ;;  %v1687_v62 = vor.u32 8388608, %v1686_v29  ;;  %v1697_v41 = vshrl.u32 %v4194_v44, %v1694_v31  ;;  %v1692_v11 = vshrl.u32 %v1691_v0, 5  ;;  %v1700_v5 = vshrl.u32 %v4195_v46, %v1694_v31 }
 0x1f7   : > { %v1659_v52 = vxor.u32 2147483648, %v1658_v30  ;;  %v910_v32 = vshll.u32 %v5311_v38, 30  ;;  %v1703_v45 = vshrl.u32 %v4196_v48, %v1694_v31  ;;  %v1706_v47 = vshrl.u32 %v4197_v50, %v1694_v31 }
 0x1f8   : > { %v1696_v58 = vshll.u32 %v4193_v40, %v1693_v59  ;;  %v1699_v8 = vshll.u32 %v4194_v44, %v1693_v59  ;;  %v1702_v56 = vshll.u32 %v4195_v46, %v1693_v59  ;;  %v1705_v51 = vshll.u32 %v4196_v48, %v1693_v59 }
 0x1f9   : > { %v1660_v35 = vsel %vm1577_vm3, %v1659_v52, %v1658_v30  ;;  %v5324_v14 = vsub.s32 %v907_v42, %v910_v32  ;;  %v1709_v3 = vshrl.u32 %v4198_v57, %v1694_v31  ;;  %v1708_v37 = vshll.u32 %v4197_v50, %v1693_v59 }
 0x1fa   : > { %v1663_v10 = vsel %vm5260_vm6, %v5035_v55, %v1660_v35  ;;  %v1698_v28 = vor.u32 %v1697_v41, %v1696_v58  ;;  %v1701_v20 = vor.u32 %v1700_v5, %v1699_v8  ;;  %v1704_v63 = vor.u32 %v1703_v45, %v1702_v56 }
 0x1fb   : > { %4086 = vcosq.f32 %v1663_v10  ;;  %v913_v39 = vsub.s32 0, %v5324_v14  ;;  %v1707_v7 = vor.u32 %v1706_v47, %v1705_v51  ;;  %v5338_v49 = vand.u32 3, %v1668_v18 }
 0x1fc   : > { %4088 = vsinq.f32 %v1663_v10  ;;  %vm849_vm3 = vcmp.lt.s32.totalorder %v5133_v53, 0  ;;  %v1710_v0 = vor.u32 %v1709_v3, %v1708_v37  ;;  %v1727_v15 = vshll.u32 %v1687_v62, 8 }
 0x1fd   : > { %v3805_v12 = vmin.u32 %v913_v39, %v5324_v14  ;;  %v933_v4 = vsub.s32 4, %v5311_v38  ;;  %v1695_v22 = vshrl.u32 %v4193_v40, %v1694_v31  ;;  %vm1711_vm4 = vcmp.lt.s32.totalorder %v1692_v11, 1 }
 0x1fe   : > { %v954_v9 = vand.u32 2139095040, %v5336_v21  ;;  %vm1712_vm5 = vcmp.lt.s32.totalorder %v1692_v11, 2  ;;  %vm1713_vm2 = vcmp.lt.s32.totalorder %v1692_v11, 3  ;;  %vm1714_vm6 = vcmp.lt.s32.totalorder %v1692_v11, 4 }
 0x1ff   : > { %v915_v59 = vclz %v3805_v12  ;;  %v1716_v34 = vsel %vm1714_vm6, %v1704_v63, 2102212464  ;;  %v1719_v16 = vsel %vm1711_vm4, %v1698_v28, %v1701_v20  ;;  %v1720_v42 = vsel %vm1714_vm6, %v1707_v7, 920167782 }
 0x200   : > { %v1723_v29 = vsel %vm1711_vm4, %v1701_v20, %v1704_v63  ;;  %vm5347_vm7 = vcmp.le.f32.partialorder %v847_v17, 0.7853982  ;;  %v1715_v61 = vsel %vm1711_vm4, %v1695_v22, %v1698_v28  ;;  %v1721_v31 = vsel %vm1713_vm2, %v1704_v63, %v1720_v42 }
 0x201   : > { %v3806_v60 = vadd.s32 4294967294, %v915_v59  ;;  %v1724_v25 = vsel %vm1714_vm6, %v1710_v0, 1326507024  ;;  %vm3341_vm8 = vcmp.eq.s32.totalorder %v5315_v1, 2  ;;  %v1717_v24 = vsel %vm1713_vm2, %v1701_v20, %v1716_v34 }
 0x202   : > { %v1722_v27 = vsel %vm1712_vm5, %v1719_v16, %v1721_v31  ;;  %v1725_v19 = vsel %vm1713_vm2, %v1707_v7, %v1724_v25  ;;  %v955_v43 = vshrl.u32 %v954_v9, 23  ;;  %vm3338_vm9 = vcmp.eq.s32.totalorder %v5315_v1, 0 }
 0x203   : > { %vm3807_vm10 = vcmp.lt.s32.totalorder %v3806_v60, 0  ;;  %v1726_v26 = vsel %vm1712_vm5, %v1723_v29, %v1725_v19  ;;  %v5355_v17 = vmul.u32.u64.low %v1727_v15, %v1722_v27  ;;  %v5356_v23 = vmul.u32.u64.high %v1727_v15, %v1722_v27, %v5355_v17 }
 0x204   : > { %vm3337_vm11 = vcmp.lt.s32.totalorder %v5315_v1, 2  ;;  %v903_v2 = vadd.s32 %v5274_v13, %v5271_v6  ;;  %v918_v30 = vsel %vm3807_vm10, 0, %v3806_v60  ;;  %vm1667_vm12 = vweird.f32 %v5035_v55 }
 0x205   : > { %v5362_v18 = vmul.u32.u64.low %v1727_v15, %v1726_v26  ;;  %v5363_v52 = vmul.u32.u64.high %v1727_v15, %v1726_v26, %v5362_v18  ;;  %v919_v32 = vsub.s32 32, %v918_v30  ;;  %v923_v62 = vsub.s32 4294967266, %v918_v30 }
 0x206   : > { %v1718_v41 = vsel %vm1712_vm5, %v1715_v61, %v1717_v24  ;;  %v3808_v5 = vadd.s32 4294967169, %v955_v43  ;;  %vm1670_vm13 = vcmp.lt.s32.totalorder %v5338_v49, 2  ;;  %v920_v45 = vshll.u32 %v5324_v14, %v918_v30 }
 0x207   : > { %v934_v47 = vsel %vm849_vm3, %v933_v4, %v5311_v38  ;;  %v951_v6 = vand.u32 2147483647, %v5336_v21  ;;  %v921_v13 = vshrl.u32 %v903_v2, %v919_v32  ;;  %v924_v35 = vadd.s32 127, %v923_v62 }
 0x208   : > { %v1737_v58 = vadd.s32 1, %v5356_v23  ;;  %v961_v8 = vadd.s32 1, %v3808_v5  ;;  %v4087_v10 = vpop.eup %4086  ;;  %vm1671_vm14 = vcmp.eq.s32.totalorder %v5338_v49, 0  ;;  %vm1674_vm15 = vcmp.eq.s32.totalorder %v5338_v49, 2 }
 0x209   : > { %v1734_v11 = vmul.u32 %v1727_v15, %v1718_v41  ;;  %vm1736_vm0 = vc.u32 %v5363_v52, %v5355_v17  ;;  %v4089_v14 = vpop.eup %4088  ;;  %v1675_v56 = vxor.u32 2147483648, %v4087_v10  ;;  %v922_v51 = vor.u32 %v921_v13, %v920_v45 }
 0x20a   : > { %v925_v38 = vshll.u32 %v924_v35, 23  ;;  %v1738_v3 = vsel %vm1736_vm0, %v1737_v58, %v5356_v23  ;;  %v1672_v39 = vxor.u32 2147483648, %v4089_v14  ;;  %v936_v28 = vsel %vm5347_vm7, 0, %v934_v47  ;;  %v5409_v23 = vpop.f32.mrf.mxu1 }
 0x20b   : > { %v1739_v37 = vadd.s32 %v1738_v3, %v1734_v11  ;;  %vm962_vm1 = vcmp.gt.s32.totalorder %v961_v8, 0  ;;  %v1676_v20 = vsel %vm1674_vm15, %v1675_v56, %v4089_v14  ;;  %v3343_v63 = vsel %vm3341_vm8, %v1675_v56, %v4089_v14 }
 0x20c   : > { %v926_v7 = vor.u32 4788187, %v925_v38  ;;  %v958_v12 = vand.u32 8388607, %v951_v6  ;;  %v1673_v0 = vsel %vm1671_vm14, %v4087_v10, %v1672_v39  ;;  %v3340_v15 = vsel %vm3338_vm9, %v4087_v10, %v1672_v39 }
 0x20d   : > { %v1740_v4 = vadd.s32 536870912, %v1739_v37  ;;  %v963_v22 = vsel %vm962_vm1, %v961_v8, 0  ;;  %v1677_v9 = vsel %vm1670_vm13, %v1673_v0, %v1676_v20  ;;  %v3344_v59 = vsel %vm3337_vm11, %v3340_v15, %v3343_v63 }
 0x20e   : > { %v927_v34 = vand.u32 2147483647, %v926_v7  ;;  %v929_v16 = vcvt.s32.f32 %v922_v51  ;;  %v1678_v42 = vsel %vm1667_vm12, nan, %v1677_v9  ;;  %v3345_v29 = vsel %vm1667_vm12, nan, %v3344_v59 }
 0x20f   : > { %v5397_v60 = vshrl.u32 %v1740_v4, 30  ;;  %v965_v61 = vand.u32 31, %v963_v22  ;;  %2003 = vst [vmem:[%s4623_s28 + $0x60] sm:$0xff] %v1678_v42  ;;  %3667 = vst [vmem:[%s4623_s28 + $0xe0] sm:$0xff] %v3345_v29  ;;  %v940_v1 = vadd.s32 3, %v936_v28  ;;  %v5402_v27 = vand.u32 3, %v936_v28 }
 0x210   : > { %v930_v31 = vmul.f32 %v929_v16, %v927_v34  ;;  %v959_v43 = vor.u32 8388608, %v958_v12  ;;  %v5406_v26 = vshrl.u32 %v963_v22, 5  ;;  %v1783_v35 = vand.u32 2147483647, %v5409_v23 }
 0x211   : > { %v1742_v49 = vshll.u32 %v5397_v60, 30  ;;  %v966_v25 = vsub.s32 32, %v965_v61  ;;  %v968_v30 = vshll.u32 %v4193_v40, %v965_v61  ;;  %v971_v5 = vshll.u32 %v4194_v44, %v965_v61 }
 0x212   : > { %v931_v24 = vxor.u32 2147483648, %v930_v31  ;;  %v974_v45 = vshll.u32 %v4195_v46, %v965_v61  ;;  %v5422_v47 = vand.u32 3, %v940_v1  ;;  %v1735_v54 = vadd.s32 %v5355_v17, %v5363_v52 }
 0x213   : > { %v5404_v19 = vsub.s32 %v1739_v37, %v1742_v49  ;;  %v969_v55 = vshrl.u32 %v4194_v44, %v966_v25  ;;  %v972_v18 = vshrl.u32 %v4195_v46, %v966_v25  ;;  %v975_v32 = vshrl.u32 %v4196_v48, %v966_v25 }
 0x214   : > { %v932_v2 = vsel %vm849_vm3, %v931_v24, %v930_v31  ;;  %v977_v11 = vshll.u32 %v4196_v48, %v965_v61  ;;  %v978_v14 = vshrl.u32 %v4197_v50, %v966_v25  ;;  %v5430_v56 = vshll.u32 %v959_v43, 8 }
 0x215   : > { %v935_v62 = vsel %vm5347_vm7, %v5133_v53, %v932_v2  ;;  %v1745_v41 = vsub.s32 0, %v5404_v19  ;;  %v970_v13 = vor.u32 %v969_v55, %v968_v30  ;;  %v973_v8 = vor.u32 %v972_v18, %v971_v5 }
 0x216   : > { %4090 = vcosq.f32 %v935_v62  ;;  %v976_v10 = vor.u32 %v975_v32, %v974_v45  ;;  %vm983_vm3 = vcmp.lt.s32.totalorder %v5406_v26, 1  ;;  %vm984_vm4 = vcmp.lt.s32.totalorder %v5406_v26, 2 }
 0x217   : > { %4092 = vsinq.f32 %v935_v62  ;;  %v3837_v58 = vmin.u32 %v1745_v41, %v5404_v19  ;;  %vm985_vm5 = vcmp.lt.s32.totalorder %v5406_v26, 3  ;;  %vm1681_vm2 = vcmp.lt.s32.totalorder %v5249_v33, 0 }
 0x218   : > { %v979_v38 = vor.u32 %v978_v14, %v977_v11  ;;  %v980_v3 = vshll.u32 %v4197_v50, %v965_v61  ;;  %v981_v17 = vshrl.u32 %v4198_v57, %v966_v25  ;;  %vm986_vm6 = vcmp.lt.s32.totalorder %v5406_v26, 4 }
 0x219   : > { %v1747_v51 = vclz %v3837_v58  ;;  %v967_v39 = vshrl.u32 %v4193_v40, %v966_v25  ;;  %v988_v28 = vsel %vm986_vm6, %v976_v10, 2102212464  ;;  %v991_v37 = vsel %vm983_vm3, %v970_v13, %v973_v8 }
 0x21a   : > { %v1765_v20 = vsub.s32 4, %v5397_v60  ;;  %v982_v63 = vor.u32 %v981_v17, %v980_v3  ;;  %v992_v7 = vsel %vm986_vm6, %v979_v38, 920167782  ;;  %v1786_v12 = vand.u32 2139095040, %v5409_v23 }
 0x21b   : > { %v3838_v52 = vadd.s32 4294967294, %v1747_v51  ;;  %vm2620_vm7 = vcmp.eq.s32.totalorder %v5402_v27, 2  ;;  %v987_v0 = vsel %vm983_vm3, %v967_v39, %v970_v13  ;;  %v993_v15 = vsel %vm985_vm5, %v976_v10, %v992_v7 }
 0x21c   : > { %v995_v4 = vsel %vm983_vm3, %v973_v8, %v976_v10  ;;  %vm2617_vm9 = vcmp.eq.s32.totalorder %v5402_v27, 0  ;;  %v989_v9 = vsel %vm985_vm5, %v973_v8, %v988_v28  ;;  %v994_v59 = vsel %vm984_vm4, %v991_v37, %v993_v15 }
 0x21d   : > { %vm3839_vm8 = vcmp.lt.s32.totalorder %v3838_v52, 0  ;;  %v996_v34 = vsel %vm986_vm6, %v982_v63, 1326507024  ;;  %vm2616_vm10 = vcmp.lt.s32.totalorder %v5402_v27, 2  ;;  %vm939_vm11 = vweird.f32 %v5133_v53 }
 0x21e   : > { %v1750_v22 = vsel %vm3839_vm8, 0, %v3838_v52  ;;  %v997_v61 = vsel %vm985_vm5, %v979_v38, %v996_v34  ;;  %vm5469_vm12 = vcmp.le.f32.partialorder %v1679_v36, 0.7853982  ;;  %v1787_v1 = vshrl.u32 %v1786_v12, 23 }
 0x21f   : > { %v1751_v16 = vsub.s32 32, %v1750_v22  ;;  %v1752_v42 = vshll.u32 %v5404_v19, %v1750_v22  ;;  %v1755_v29 = vsub.s32 4294967266, %v1750_v22  ;;  %v998_v49 = vsel %vm984_vm4, %v995_v4, %v997_v61 }
 0x220   : > { %v5476_v25 = vmul.u32.u64.low %v5430_v56, %v994_v59  ;;  %v5477_v24 = vmul.u32.u64.high %v5430_v56, %v994_v59, %v5476_v25  ;;  %v5481_v55 = vmul.u32.u64.low %v5430_v56, %v998_v49  ;;  %v5482_v2 = vmul.u32.u64.high %v5430_v56, %v998_v49, %v5481_v55 }
 0x221   : > { %v1753_v19 = vshrl.u32 %v1735_v54, %v1751_v16  ;;  %v1756_v43 = vadd.s32 127, %v1755_v29  ;;  %vm942_vm13 = vcmp.lt.s32.totalorder %v5422_v47, 2  ;;  %vm943_vm14 = vcmp.eq.s32.totalorder %v5422_v47, 0 }
 0x222   : > { %v990_v36 = vsel %vm984_vm4, %v987_v0, %v989_v9  ;;  %v3840_v30 = vadd.s32 4294967169, %v1787_v1  ;;  %vm946_vm15 = vcmp.eq.s32.totalorder %v5422_v47, 2  ;;  %v1766_v41 = vsel %vm1681_vm2, %v1765_v20, %v5397_v60  ;;  %v5517_v0 = vpop.f32.mrf.mxu0 }
 0x223   : > { %v4091_v18 = vpop.eup %4090  ;;  %v1754_v32 = vor.u32 %v1753_v19, %v1752_v42  ;;  %v1757_v62 = vshll.u32 %v1756_v43, 23  ;;  %v1009_v13 = vadd.s32 1, %v5477_v24  ;;  %v1790_v58 = vand.u32 8388607, %v1783_v35 }
 0x224   : > { %v4093_v5 = vpop.eup %4092  ;;  %v947_v45 = vxor.u32 2147483648, %v4091_v18  ;;  %v1793_v8 = vadd.s32 1, %v3840_v30  ;;  %v1006_v11 = vmul.u32 %v5430_v56, %v990_v36  ;;  %vm1008_vm0 = vc.u32 %v5482_v2, %v5476_v25 }
 0x225   : > { %v944_v26 = vxor.u32 2147483648, %v4093_v5  ;;  %v1758_v10 = vor.u32 4788187, %v1757_v62  ;;  %v1761_v54 = vcvt.s32.f32 %v1754_v32  ;;  %v1010_v17 = vsel %vm1008_vm0, %v1009_v13, %v5477_v24 }
 0x226   : > { %v948_v14 = vsel %vm946_vm15, %v947_v45, %v4093_v5  ;;  %v2622_v51 = vsel %vm2620_vm7, %v947_v45, %v4093_v5  ;;  %vm1794_vm1 = vcmp.gt.s32.totalorder %v1793_v8, 0  ;;  %v1011_v39 = vadd.s32 %v1010_v17, %v1006_v11 }
 0x227   : > { %v945_v60 = vsel %vm943_vm14, %v4091_v18, %v944_v26  ;;  %v2619_v38 = vsel %vm2617_vm9, %v4091_v18, %v944_v26  ;;  %v1759_v3 = vand.u32 2147483647, %v1758_v10  ;;  %v1795_v28 = vsel %vm1794_vm1, %v1793_v8, 0 }
 0x228   : > { %v949_v56 = vsel %vm942_vm13, %v945_v60, %v948_v14  ;;  %v2623_v52 = vsel %vm2616_vm10, %v2619_v38, %v2622_v51  ;;  %v1768_v7 = vsel %vm5469_vm12, 0, %v1766_v41  ;;  %v1012_v12 = vadd.s32 536870912, %v1011_v39 }
 0x229   : > { %v950_v37 = vsel %vm939_vm11, nan, %v949_v56  ;;  %v2624_v20 = vsel %vm939_vm11, nan, %v2623_v52  ;;  %v1762_v63 = vmul.f32 %v1761_v54, %v1759_v3  ;;  %v1797_v47 = vand.u32 31, %v1795_v28 }
 0x22a   : > { %1996 = vst [vmem:[%s4623_s28 + $0x28] sm:$0xff] %v950_v37  ;;  %3660 = vst [vmem:[%s4623_s28 + $0xa8] sm:$0xff] %v2624_v20  ;;  %v1772_v15 = vadd.s32 3, %v1768_v7  ;;  %v5519_v4 = vshrl.u32 %v1012_v12, 30  ;;  %v1791_v22 = vor.u32 8388608, %v1790_v58  ;;  %v1796_v59 = vshrl.u32 %v1795_v28, 5 }
 0x22b   : > { %v1763_v27 = vxor.u32 2147483648, %v1762_v63  ;;  %v1798_v9 = vsub.s32 32, %v1797_v47  ;;  %v1800_v34 = vshll.u32 %v4193_v40, %v1797_v47  ;;  %v1058_v16 = vand.u32 2139095040, %v5517_v0 }
 0x22c   : > { %v1014_v29 = vshll.u32 %v5519_v4, 30  ;;  %v1803_v61 = vshll.u32 %v4194_v44, %v1797_v47  ;;  %v1806_v49 = vshll.u32 %v4195_v46, %v1797_v47  ;;  %v1809_v55 = vshll.u32 %v4196_v48, %v1797_v47 }
 0x22d   : > { %v1764_v53 = vsel %vm1681_vm2, %v1763_v27, %v1762_v63  ;;  %v1801_v24 = vshrl.u32 %v4194_v44, %v1798_v9  ;;  %v1804_v1 = vshrl.u32 %v4195_v46, %v1798_v9  ;;  %v1807_v19 = vshrl.u32 %v4196_v48, %v1798_v9 }
 0x22e   : > { %v1767_v42 = vsel %vm5469_vm12, %v5249_v33, %v1764_v53  ;;  %v5534_v43 = vsub.s32 %v1011_v39, %v1014_v29  ;;  %v1810_v31 = vshrl.u32 %v4197_v50, %v1798_v9  ;;  %v5538_v32 = vand.u32 3, %v1772_v15 }
 0x22f   : > { %4094 = vcosq.f32 %v1767_v42  ;;  %v1802_v36 = vor.u32 %v1801_v24, %v1800_v34  ;;  %v1805_v30 = vor.u32 %v1804_v1, %v1803_v61  ;;  %v1808_v18 = vor.u32 %v1807_v19, %v1806_v49 }
 0x230   : > { %4096 = vsinq.f32 %v1767_v42  ;;  %v5540_v62 = vand.u32 3, %v1768_v7  ;;  %v1017_v41 = vsub.s32 0, %v5534_v43  ;;  %v1811_v5 = vor.u32 %v1810_v31, %v1809_v55 }
 0x231   : > { %v1812_v45 = vshll.u32 %v4197_v50, %v1797_v47  ;;  %v1813_v13 = vshrl.u32 %v4198_v57, %v1798_v9  ;;  %v5545_v58 = vshll.u32 %v1791_v22, 8  ;;  %v1059_v8 = vshrl.u32 %v1058_v16, 23 }
 0x232   : > { %vm953_vm3 = vcmp.lt.s32.totalorder %v5336_v21, 0  ;;  %v3809_v26 = vmin.u32 %v1017_v41, %v5534_v43  ;;  %v1799_v10 = vshrl.u32 %v4193_v40, %v1798_v9  ;;  %vm1815_vm4 = vcmp.lt.s32.totalorder %v1796_v59, 1 }
 0x233   : > { %vm1818_vm5 = vcmp.lt.s32.totalorder %v1796_v59, 4  ;;  %v1814_v54 = vor.u32 %v1813_v13, %v1812_v45  ;;  %v1823_v14 = vsel %vm1815_vm4, %v1802_v36, %v1805_v30  ;;  %vm3444_vm2 = vcmp.eq.s32.totalorder %v5540_v62, 2 }
 0x234   : > { %v1820_v11 = vsel %vm1818_vm5, %v1808_v18, 2102212464  ;;  %v1824_v51 = vsel %vm1818_vm5, %v1811_v5, 920167782  ;;  %v1019_v60 = vclz %v3809_v26  ;;  %vm1816_vm6 = vcmp.lt.s32.totalorder %v1796_v59, 2 }
 0x235   : > { %vm1817_vm7 = vcmp.lt.s32.totalorder %v1796_v59, 3  ;;  %v1819_v38 = vsel %vm1815_vm4, %v1799_v10, %v1802_v36  ;;  %vm3441_vm8 = vcmp.eq.s32.totalorder %v5540_v62, 0  ;;  %v1827_v56 = vsel %vm1815_vm4, %v1805_v30, %v1808_v18 }
 0x236   : > { %v1821_v3 = vsel %vm1817_vm7, %v1805_v30, %v1820_v11  ;;  %v1825_v17 = vsel %vm1817_vm7, %v1808_v18, %v1824_v51  ;;  %v1828_v52 = vsel %vm1818_vm5, %v1814_v54, 1326507024  ;;  %vm1774_vm9 = vcmp.lt.s32.totalorder %v5538_v32, 2 }
 0x237   : > { %vm3440_vm10 = vcmp.lt.s32.totalorder %v5540_v62, 2  ;;  %v3810_v39 = vadd.s32 4294967294, %v1019_v60  ;;  %v1037_v28 = vsub.s32 4, %v5519_v4  ;;  %v1826_v37 = vsel %vm1816_vm6, %v1823_v14, %v1825_v17  ;;  %v5610_v17 = vpop.f32.mrf.mxu1 }
 0x238   : > { %v1829_v20 = vsel %vm1817_vm7, %v1811_v5, %v1828_v52  ;;  %vm1771_vm11 = vweird.f32 %v5249_v33  ;;  %v1822_v63 = vsel %vm1816_vm6, %v1819_v38, %v1821_v3  ;;  %v3812_v22 = vadd.s32 4294967169, %v1059_v8 }
 0x239   : > { %v1830_v7 = vsel %vm1816_vm6, %v1827_v56, %v1829_v20  ;;  %v5560_v12 = vmul.u32.u64.low %v5545_v58, %v1826_v37  ;;  %v5561_v47 = vmul.u32.u64.high %v5545_v58, %v1826_v37, %v5560_v12  ;;  %vm3811_vm12 = vcmp.lt.s32.totalorder %v3810_v39, 0 }
 0x23a   : > { %v5565_v27 = vmul.u32.u64.low %v5545_v58, %v1830_v7  ;;  %v5566_v15 = vmul.u32.u64.high %v5545_v58, %v1830_v7, %v5565_v27  ;;  %vm1775_vm13 = vcmp.eq.s32.totalorder %v5538_v32, 0  ;;  %vm1778_vm14 = vcmp.eq.s32.totalorder %v5538_v32, 2 }
 0x23b   : > { %v1022_v9 = vsel %vm3811_vm12, 0, %v3810_v39  ;;  %v1055_v53 = vand.u32 2147483647, %v5517_v0  ;;  %v1007_v34 = vadd.s32 %v5476_v25, %v5482_v2  ;;  %v1065_v29 = vadd.s32 1, %v3812_v22 }
 0x23c   : > { %v4095_v59 = vpop.eup %4094  ;;  %v1023_v16 = vsub.s32 32, %v1022_v9  ;;  %v1027_v42 = vsub.s32 4294967266, %v1022_v9  ;;  %v1038_v24 = vsel %vm953_vm3, %v1037_v28, %v5519_v4  ;;  %v1838_v1 = vmul.u32 %v5545_v58, %v1822_v63 }
 0x23d   : > { %v4097_v61 = vpop.eup %4096  ;;  %v1779_v49 = vxor.u32 2147483648, %v4095_v59  ;;  %v1841_v19 = vadd.s32 1, %v5561_v47  ;;  %v1024_v31 = vshll.u32 %v5534_v43, %v1022_v9  ;;  %vm1840_vm15 = vc.u32 %v5566_v15, %v5560_v12 }
 0x23e   : > { %v1776_v55 = vxor.u32 2147483648, %v4097_v61  ;;  %v1025_v36 = vshrl.u32 %v1007_v34, %v1023_v16  ;;  %v1028_v30 = vadd.s32 127, %v1027_v42  ;;  %vm1066_vm0 = vcmp.gt.s32.totalorder %v1065_v29, 0 }
 0x23f   : > { %v1780_v25 = vsel %vm1778_vm14, %v1779_v49, %v4097_v61  ;;  %v3446_v2 = vsel %vm3444_vm2, %v1779_v49, %v4097_v61  ;;  %v1842_v13 = vsel %vm1840_vm15, %v1841_v19, %v5561_v47  ;;  %v1067_v58 = vsel %vm1066_vm0, %v1065_v29, 0 }
 0x240   : > { %v1777_v4 = vsel %vm1775_vm13, %v4095_v59, %v1776_v55  ;;  %v3443_v43 = vsel %vm3441_vm8, %v4095_v59, %v1776_v55  ;;  %v1026_v18 = vor.u32 %v1025_v36, %v1024_v31  ;;  %v1029_v41 = vshll.u32 %v1028_v30, 23 }
 0x241   : > { %v1781_v5 = vsel %vm1774_vm9, %v1777_v4, %v1780_v25  ;;  %v3447_v45 = vsel %vm3440_vm10, %v3443_v43, %v3446_v2  ;;  %vm5600_vm1 = vcmp.le.f32.partialorder %v951_v6, 0.7853982  ;;  %v1843_v54 = vadd.s32 %v1842_v13, %v1838_v1 }
 0x242   : > { %v1782_v8 = vsel %vm1771_vm11, nan, %v1781_v5  ;;  %v3448_v26 = vsel %vm1771_vm11, nan, %v3447_v45  ;;  %v1030_v32 = vor.u32 4788187, %v1029_v41  ;;  %v1040_v62 = vsel %vm5600_vm1, 0, %v1038_v24 }
 0x243   : > { %2004 = vst [vmem:[%s4623_s28 + $0x68] sm:$0xff] %v1782_v8  ;;  %3668 = vst [vmem:[%s4623_s28 + $0xe8] sm:$0xff] %v3448_v26  ;;  %v1062_v11 = vand.u32 8388607, %v1055_v53  ;;  %v1069_v14 = vand.u32 31, %v1067_v58  ;;  %v1033_v33 = vcvt.s32.f32 %v1026_v18  ;;  %v1844_v60 = vadd.s32 536870912, %v1843_v54 }
 0x244   : > { %v1031_v51 = vand.u32 2147483647, %v1030_v32  ;;  %v1044_v6 = vadd.s32 3, %v1040_v62  ;;  %v1068_v39 = vshrl.u32 %v1067_v58, 5  ;;  %v1890_v9 = vand.u32 2139095040, %v5610_v17 }
 0x245   : > { %v1070_v38 = vsub.s32 32, %v1069_v14  ;;  %v5612_v56 = vshrl.u32 %v1844_v60, 30  ;;  %v1063_v52 = vor.u32 8388608, %v1062_v11  ;;  %v1072_v27 = vshll.u32 %v4193_v40, %v1069_v14 }
 0x246   : > { %v1034_v3 = vmul.f32 %v1033_v33, %v1031_v51  ;;  %v1075_v22 = vshll.u32 %v4194_v44, %v1069_v14  ;;  %v1078_v34 = vshll.u32 %v4195_v46, %v1069_v14  ;;  %v1081_v16 = vshll.u32 %v4196_v48, %v1069_v14 }
 0x247   : > { %v1073_v28 = vshrl.u32 %v4194_v44, %v1070_v38  ;;  %v1076_v20 = vshrl.u32 %v4195_v46, %v1070_v38  ;;  %v1079_v63 = vshrl.u32 %v4196_v48, %v1070_v38  ;;  %v1082_v7 = vshrl.u32 %v4197_v50, %v1070_v38 }
 0x248   : > { %v1035_v37 = vxor.u32 2147483648, %v1034_v3  ;;  %v1846_v47 = vshll.u32 %v5612_v56, 30  ;;  %v1085_v42 = vshrl.u32 %v4198_v57, %v1070_v38  ;;  %v1084_v24 = vshll.u32 %v4197_v50, %v1069_v14 }
 0x249   : > { %v1074_v49 = vor.u32 %v1073_v28, %v1072_v27  ;;  %v1077_v1 = vor.u32 %v1076_v20, %v1075_v22  ;;  %v1080_v19 = vor.u32 %v1079_v63, %v1078_v34  ;;  %v1083_v55 = vor.u32 %v1082_v7, %v1081_v16 }
 0x24a   : > { %v1036_v59 = vsel %vm953_vm3, %v1035_v37, %v1034_v3  ;;  %v5630_v61 = vsub.s32 %v1843_v54, %v1846_v47  ;;  %v5633_v31 = vand.u32 3, %v1040_v62  ;;  %v5636_v30 = vand.u32 3, %v1044_v6 }
 0x24b   : > { %v1039_v29 = vsel %vm5600_vm1, %v5336_v21, %v1036_v59  ;;  %v1071_v25 = vshrl.u32 %v4193_v40, %v1070_v38  ;;  %v1086_v2 = vor.u32 %v1085_v42, %v1084_v24  ;;  %v1103_v4 = vshll.u32 %v1063_v52, 8 }
 0x24c   : > { %4098 = vcosq.f32 %v1039_v29  ;;  %v1849_v36 = vsub.s32 0, %v5630_v61  ;;  %vm1087_vm3 = vcmp.lt.s32.totalorder %v1068_v39, 1  ;;  %vm1088_vm4 = vcmp.lt.s32.totalorder %v1068_v39, 2 }
 0x24d   : > { %4100 = vsinq.f32 %v1039_v29  ;;  %vm1090_vm5 = vcmp.lt.s32.totalorder %v1068_v39, 4  ;;  %v1095_v41 = vsel %vm1087_vm3, %v1074_v49, %v1077_v1  ;;  %v1891_v45 = vshrl.u32 %v1890_v9, 23 }
 0x24e   : > { %v3841_v43 = vmin.u32 %v1849_v36, %v5630_v61  ;;  %v1092_v18 = vsel %vm1090_vm5, %v1080_v19, 2102212464  ;;  %v1096_v5 = vsel %vm1090_vm5, %v1083_v55, 920167782  ;;  %vm1089_vm2 = vcmp.lt.s32.totalorder %v1068_v39, 3 }
 0x24f   : > { %v1091_v58 = vsel %vm1087_vm3, %v1071_v25, %v1074_v49  ;;  %v1099_v8 = vsel %vm1087_vm3, %v1077_v1, %v1080_v19  ;;  %v1093_v26 = vsel %vm1089_vm2, %v1077_v1, %v1092_v18  ;;  %v1097_v10 = vsel %vm1089_vm2, %v1080_v19, %v1096_v5 }
 0x250   : > { %v1851_v13 = vclz %v3841_v43  ;;  %v1100_v32 = vsel %vm1090_vm5, %v1086_v2, 1326507024  ;;  %v3844_v62 = vadd.s32 4294967169, %v1891_v45  ;;  %v1098_v11 = vsel %vm1088_vm4, %v1095_v41, %v1097_v10 }
 0x251   : > { %v1101_v14 = vsel %vm1089_vm2, %v1083_v55, %v1100_v32  ;;  %vm2720_vm6 = vcmp.eq.s32.totalorder %v5633_v31, 0  ;;  %vm2723_vm7 = vcmp.eq.s32.totalorder %v5633_v31, 2  ;;  %vm1785_vm8 = vcmp.lt.s32.totalorder %v5409_v23, 0 }
 0x252   : > { %v3842_v54 = vadd.s32 4294967294, %v1851_v13  ;;  %v1102_v51 = vsel %vm1088_vm4, %v1099_v8, %v1101_v14  ;;  %v5645_v33 = vmul.u32.u64.low %v1103_v4, %v1098_v11  ;;  %v5646_v60 = vmul.u32.u64.high %v1103_v4, %v1098_v11, %v5645_v33 }
 0x253   : > { %vm2719_vm9 = vcmp.lt.s32.totalorder %v5633_v31, 2  ;;  %v1094_v38 = vsel %vm1088_vm4, %v1091_v58, %v1093_v26  ;;  %v5651_v3 = vmul.u32.u64.low %v1103_v4, %v1102_v51  ;;  %v5652_v6 = vmul.u32.u64.high %v1103_v4, %v1102_v51, %v5651_v3 }
 0x254   : > { %vm3843_vm10 = vcmp.lt.s32.totalorder %v3842_v54, 0  ;;  %vm1043_vm11 = vweird.f32 %v5336_v21  ;;  %vm1046_vm12 = vcmp.lt.s32.totalorder %v5636_v30, 2  ;;  %vm1047_vm13 = vcmp.eq.s32.totalorder %v5636_v30, 0 }
 0x255   : > { %v1854_v52 = vsel %vm3843_vm10, 0, %v3842_v54  ;;  %v1897_v28 = vadd.s32 1, %v3844_v62  ;;  %v1839_v37 = vadd.s32 %v5560_v12, %v5566_v15  ;;  %v1887_v7 = vand.u32 2147483647, %v5610_v17 }
 0x256   : > { %v1855_v20 = vsub.s32 32, %v1854_v52  ;;  %v1859_v63 = vsub.s32 4294967266, %v1854_v52  ;;  %v1869_v39 = vsub.s32 4, %v5612_v56  ;;  %v1110_v47 = vmul.u32 %v1103_v4, %v1094_v38 }
 0x257   : > { %v1113_v27 = vadd.s32 1, %v5646_v60  ;;  %vm1898_vm14 = vcmp.gt.s32.totalorder %v1897_v28, 0  ;;  %v1856_v9 = vshll.u32 %v5630_v61, %v1854_v52  ;;  %vm1112_vm15 = vc.u32 %v5652_v6, %v5645_v33 }
 0x258   : > { %v1857_v59 = vshrl.u32 %v1839_v37, %v1855_v20  ;;  %v1860_v34 = vadd.s32 127, %v1859_v63  ;;  %vm1050_vm0 = vcmp.eq.s32.totalorder %v5636_v30, 2  ;;  %v1899_v42 = vsel %vm1898_vm14, %v1897_v28, 0 }
 0x259   : > { %v4099_v22 = vpop.eup %4098  ;;  %v1114_v15 = vsel %vm1112_vm15, %v1113_v27, %v5646_v60  ;;  %v1894_v55 = vand.u32 8388607, %v1887_v7  ;;  %v1901_v36 = vand.u32 31, %v1899_v42  ;;  %v1870_v43 = vsel %vm1785_vm8, %v1869_v39, %v5612_v56 }
 0x25a   : > { %v4101_v16 = vpop.eup %4100  ;;  %v1051_v12 = vxor.u32 2147483648, %v4099_v22  ;;  %v1858_v49 = vor.u32 %v1857_v59, %v1856_v9  ;;  %v1861_v24 = vshll.u32 %v1860_v34, 23  ;;  %v1115_v1 = vadd.s32 %v1114_v15, %v1110_v47 }
 0x25b   : > { %v1048_v29 = vxor.u32 2147483648, %v4101_v16  ;;  %v1902_v45 = vsub.s32 32, %v1901_v36  ;;  %vm5692_vm1 = vcmp.le.f32.partialorder %v1783_v35, 0.7853982  ;;  %v1895_v21 = vor.u32 8388608, %v1894_v55 }
 0x25c   : > { %v1052_v19 = vsel %vm1050_vm0, %v1051_v12, %v4101_v16  ;;  %v2725_v61 = vsel %vm2723_vm7, %v1051_v12, %v4101_v16  ;;  %v1862_v4 = vor.u32 4788187, %v1861_v24  ;;  %v1116_v5 = vadd.s32 536870912, %v1115_v1 }
 0x25d   : > { %v1049_v25 = vsel %vm1047_vm13, %v4099_v22, %v1048_v29  ;;  %v2722_v2 = vsel %vm2720_vm6, %v4099_v22, %v1048_v29  ;;  %v1865_v26 = vcvt.s32.f32 %v1858_v49  ;;  %v1872_v30 = vsel %vm5692_vm1, 0, %v1870_v43 }
 0x25e   : > { %v1053_v18 = vsel %vm1046_vm12, %v1049_v25, %v1052_v19  ;;  %v2726_v41 = vsel %vm2719_vm9, %v2722_v2, %v2725_v61  ;;  %v1863_v8 = vand.u32 2147483647, %v1862_v4  ;;  %v5688_v10 = vshrl.u32 %v1116_v5, 30 }
 0x25f   : > { %v1054_v13 = vsel %vm1043_vm11, nan, %v1053_v18  ;;  %v2727_v58 = vsel %vm1043_vm11, nan, %v2726_v41  ;;  %v1905_v62 = vshrl.u32 %v4194_v44, %v1902_v45  ;;  %v1908_v11 = vshrl.u32 %v4195_v46, %v1902_v45 }
 0x260   : > { %1997 = vst [vmem:[%s4623_s28 + $0x30] sm:$0xff] %v1054_v13  ;;  %3661 = vst [vmem:[%s4623_s28 + $0xb0] sm:$0xff] %v2727_v58  ;;  %v1866_v31 = vmul.f32 %v1865_v26, %v1863_v8  ;;  %v1118_v32 = vshll.u32 %v5688_v10, 30  ;;  %v1911_v14 = vshrl.u32 %v4196_v48, %v1902_v45  ;;  %v1914_v51 = vshrl.u32 %v4197_v50, %v1902_v45 }
 0x261   : > { %v1900_v60 = vshrl.u32 %v1899_v42, 5  ;;  %v1904_v38 = vshll.u32 %v4193_v40, %v1901_v36  ;;  %v1917_v3 = vshrl.u32 %v4198_v57, %v1902_v45  ;;  %v1907_v28 = vshll.u32 %v4194_v44, %v1901_v36 }
 0x262   : > { %v1867_v54 = vxor.u32 2147483648, %v1866_v31  ;;  %v1119_v35 = vsub.s32 %v1115_v1, %v1118_v32  ;;  %v1910_v37 = vshll.u32 %v4195_v46, %v1901_v36  ;;  %v1913_v20 = vshll.u32 %v4196_v48, %v1901_v36 }
 0x263   : > { %v1906_v47 = vor.u32 %v1905_v62, %v1904_v38  ;;  %v1916_v27 = vshll.u32 %v4197_v50, %v1901_v36  ;;  %v1909_v22 = vor.u32 %v1908_v11, %v1907_v28  ;;  %v1876_v44 = vadd.s32 3, %v1872_v30 }
 0x264   : > { %v1868_v52 = vsel %vm1785_vm8, %v1867_v54, %v1866_v31  ;;  %v1121_v39 = vsub.s32 0, %v1119_v35  ;;  %v1912_v57 = vor.u32 %v1911_v14, %v1910_v37  ;;  %v1915_v9 = vor.u32 %v1914_v51, %v1913_v20 }
 0x265   : > { %v1871_v63 = vsel %vm5692_vm1, %v5409_v23, %v1868_v52  ;;  %v1918_v34 = vor.u32 %v1917_v3, %v1916_v27  ;;  %v1903_v46 = vshrl.u32 %v4193_v40, %v1902_v45  ;;  %v1935_v16 = vshll.u32 %v1895_v21, 8 }
 0x266   : > { %4102 = vcosq.f32 %v1871_v63  ;;  %v3813_v59 = vmin.u32 %v1121_v39, %v1119_v35  ;;  %vm1919_vm3 = vcmp.lt.s32.totalorder %v1900_v60, 1  ;;  %vm1921_vm4 = vcmp.lt.s32.totalorder %v1900_v60, 3 }
 0x267   : > { %4104 = vsinq.f32 %v1871_v63  ;;  %vm1922_vm5 = vcmp.lt.s32.totalorder %v1900_v60, 4  ;;  %v1927_v15 = vsel %vm1919_vm3, %v1906_v47, %v1909_v22  ;;  %v1931_v29 = vsel %vm1919_vm3, %v1909_v22, %v1912_v57 }
 0x268   : > { %v1123_v48 = vclz %v3813_v59  ;;  %v1924_v12 = vsel %vm1922_vm5, %v1912_v57, 2102212464  ;;  %v1928_v42 = vsel %vm1922_vm5, %v1915_v9, 920167782  ;;  %vm1920_vm2 = vcmp.lt.s32.totalorder %v1900_v60, 2 }
 0x269   : > { %v1929_v49 = vsel %vm1921_vm4, %v1912_v57, %v1928_v42  ;;  %v1932_v24 = vsel %vm1922_vm5, %v1918_v34, 1326507024  ;;  %v1923_v1 = vsel %vm1919_vm3, %v1903_v46, %v1906_v47  ;;  %v1925_v19 = vsel %vm1921_vm4, %v1909_v22, %v1924_v12 }
 0x26a   : > { %v3814_v50 = vadd.s32 4294967294, %v1123_v48  ;;  %v1930_v61 = vsel %vm1920_vm2, %v1927_v15, %v1929_v49  ;;  %v1933_v55 = vsel %vm1921_vm4, %v1915_v9, %v1932_v24  ;;  %v3542_v2 = vand.u32 3, %v1872_v30 }
 0x26b   : > { %v1934_v40 = vsel %vm1920_vm2, %v1931_v29, %v1933_v55  ;;  %v5717_v36 = vmul.u32.u64.low %v1935_v16, %v1930_v61  ;;  %v5718_v25 = vmul.u32.u64.high %v1935_v16, %v1930_v61, %v5717_v36  ;;  %v1111_v41 = vadd.s32 %v5645_v33, %v5652_v6 }
 0x26c   : > { %vm3815_vm6 = vcmp.lt.s32.totalorder %v3814_v50, 0  ;;  %v5721_v43 = vmul.u32.u64.low %v1935_v16, %v1934_v40  ;;  %v5722_v18 = vmul.u32.u64.high %v1935_v16, %v1934_v40, %v5721_v43  ;;  %v1926_v13 = vsel %vm1920_vm2, %v1923_v1, %v1925_v19 }
 0x26d   : > { %v1126_v4 = vsel %vm3815_vm6, 0, %v3814_v50  ;;  %v1877_v58 = vand.u32 3, %v1876_v44  ;;  %v1945_v31 = vadd.s32 1, %v5718_v25  ;;  %v1942_v32 = vmul.u32 %v1935_v16, %v1926_v13 }
 0x26e   : > { %v1127_v5 = vsub.s32 32, %v1126_v4  ;;  %v1131_v45 = vsub.s32 4294967266, %v1126_v4  ;;  %v1128_v8 = vshll.u32 %v1119_v35, %v1126_v4  ;;  %vm1944_vm7 = vc.u32 %v5722_v18, %v5717_v36 }
 0x26f   : > { %vm3543_vm8 = vcmp.lt.s32.totalorder %v3542_v2, 2  ;;  %v1946_v33 = vsel %vm1944_vm7, %v1945_v31, %v5718_v25  ;;  %vm3544_vm9 = vcmp.eq.s32.totalorder %v3542_v2, 0  ;;  %vm3547_vm10 = vcmp.eq.s32.totalorder %v3542_v2, 2 }
 0x270   : > { %v1129_v26 = vshrl.u32 %v1111_v41, %v1127_v5  ;;  %v1132_v56 = vadd.s32 127, %v1131_v45  ;;  %v1947_v11 = vadd.s32 %v1946_v33, %v1942_v32  ;;  %vm1878_vm11 = vcmp.lt.s32.totalorder %v1877_v58, 2 }
 0x271   : > { %vm1882_vm12 = vcmp.eq.s32.totalorder %v1877_v58, 2  ;;  %vm1879_vm13 = vcmp.eq.s32.totalorder %v1877_v58, 0  ;;  %vm1875_vm14 = vweird.f32 %v5409_v23  ;;  %vm1057_vm15 = vcmp.lt.s32.totalorder %v5517_v0, 0 }
 0x272   : > { %v1130_v21 = vor.u32 %v1129_v26, %v1128_v8  ;;  %v1133_v62 = vshll.u32 %v1132_v56, 23  ;;  %v1948_v38 = vadd.s32 536870912, %v1947_v11  ;;  %v1141_v59 = vsub.s32 4, %v5688_v10 }
 0x273   : > { %v4103_v30 = vpop.eup %4102  ;;  %vm1056_vm0 = vcmp.le.f32.partialorder %v1055_v53, 0.7853982  ;;  %v1943_v49 = vadd.s32 %v5717_v36, %v5722_v18 }
 0x274   : > { %v4105_v6 = vpop.eup %4104  ;;  %v1883_v54 = vxor.u32 2147483648, %v4103_v30  ;;  %v1134_v51 = vor.u32 4788187, %v1133_v62  ;;  %v1137_v37 = vcvt.s32.f32 %v1130_v21  ;;  %v5733_v39 = vshrl.u32 %v1948_v38, 30 }
 0x275   : > { %v1880_v14 = vxor.u32 2147483648, %v4105_v6  ;;  %v1142_v16 = vsel %vm1057_vm15, %v1141_v59, %v5688_v10 }
 0x276   : > { %v1884_v35 = vsel %vm1882_vm12, %v1883_v54, %v4105_v6  ;;  %v3549_v60 = vsel %vm3547_vm10, %v1883_v54, %v4105_v6  ;;  %v1135_v28 = vand.u32 2147483647, %v1134_v51  ;;  %v1950_v57 = vshll.u32 %v5733_v39, 30 }
 0x277   : > { %v1881_v3 = vsel %vm1879_vm13, %v4103_v30, %v1880_v14  ;;  %v3546_v52 = vsel %vm3544_vm9, %v4103_v30, %v1880_v14  ;;  %v1144_v15 = vsel %vm1056_vm0, 0, %v1142_v16  ;;  %vm1889_vm9 = vcmp.lt.s32.totalorder %v5610_v17, 0 }
 0x278   : > { %v1885_v20 = vsel %vm1878_vm11, %v1881_v3, %v1884_v35  ;;  %v3550_v63 = vsel %vm3543_vm8, %v3546_v52, %v3549_v60  ;;  %v1138_v22 = vmul.f32 %v1137_v37, %v1135_v28  ;;  %v1951_v34 = vsub.s32 %v1947_v11, %v1950_v57 }
 0x279   : > { %v1886_v47 = vsel %vm1875_vm14, nan, %v1885_v20  ;;  %v3551_v27 = vsel %vm1875_vm14, nan, %v3550_v63  ;;  %v1148_v29 = vadd.s32 3, %v1144_v15  ;;  %v2821_v1 = vand.u32 3, %v1144_v15 }
 0x27a   : > { %2005 = vst [vmem:[%s4623_s28 + $0x70] sm:$0xff] %v1886_v47  ;;  %3669 = vst [vmem:[%s4623_s28 + $0xf0] sm:$0xff] %v3551_v27  ;;  %v1139_v9 = vxor.u32 2147483648, %v1138_v22  ;;  %v1953_v46 = vsub.s32 0, %v1951_v34  ;;  %vm1147_vm8 = vweird.f32 %v5517_v0  ;;  %v1973_v62 = vsub.s32 4, %v5733_v39 }
 0x27b   : > { %v1149_v19 = vand.u32 3, %v1148_v29  ;;  %vm2822_vm3 = vcmp.lt.s32.totalorder %v2821_v1, 2  ;;  %vm2823_vm4 = vcmp.eq.s32.totalorder %v2821_v1, 0  ;;  %vm2826_vm2 = vcmp.eq.s32.totalorder %v2821_v1, 2 }
 0x27c   : > { %v1140_v23 = vsel %vm1057_vm15, %v1139_v9, %v1138_v22  ;;  %v3845_v48 = vmin.u32 %v1953_v46, %v1951_v34  ;;  %vm1888_vm10 = vcmp.le.f32.partialorder %v1887_v7, 0.7853982  ;;  %v1974_v6 = vsel %vm1889_vm9, %v1973_v62, %v5733_v39 }
 0x27d   : > { %v1143_v44 = vsel %vm1056_vm0, %v5517_v0, %v1140_v23  ;;  %vm1154_vm5 = vcmp.eq.s32.totalorder %v1149_v19, 2  ;;  %vm1150_vm6 = vcmp.lt.s32.totalorder %v1149_v19, 2  ;;  %vm1151_vm7 = vcmp.eq.s32.totalorder %v1149_v19, 0 }
 0x27e   : > { %4106 = vcosq.f32 %v1143_v44  ;;  %v1955_v12 = vclz %v3845_v48  ;;  %v1976_v54 = vsel %vm1888_vm10, 0, %v1974_v6 }
 0x27f   : > { %4108 = vsinq.f32 %v1143_v44  ;;  %v1980_v11 = vadd.s32 3, %v1976_v54  ;;  %v3645_v51 = vand.u32 3, %v1976_v54 }
 0x280   : > { %v3846_v42 = vadd.s32 4294967294, %v1955_v12 }
 0x281   : > { %v1981_v14 = vand.u32 3, %v1980_v11  ;;  %vm3650_vm12 = vcmp.eq.s32.totalorder %v3645_v51, 2  ;;  %vm3647_vm14 = vcmp.eq.s32.totalorder %v3645_v51, 0  ;;  %vm3646_vm0 = vcmp.lt.s32.totalorder %v3645_v51, 2 }
 0x282   : > { %vm3847_vm1 = vcmp.lt.s32.totalorder %v3846_v42, 0 }
 0x283   : > { %v1958_v50 = vsel %vm3847_vm1, 0, %v3846_v42  ;;  %vm1986_vm11 = vcmp.eq.s32.totalorder %v1981_v14, 2  ;;  %vm1983_vm13 = vcmp.eq.s32.totalorder %v1981_v14, 0  ;;  %vm1982_vm15 = vcmp.lt.s32.totalorder %v1981_v14, 2 }
 0x284   : > { %v1959_v24 = vsub.s32 32, %v1958_v50  ;;  %v1963_v53 = vsub.s32 4294967266, %v1958_v50  ;;  %v1960_v61 = vshll.u32 %v1951_v34, %v1958_v50  ;;  %vm1979_vm1 = vweird.f32 %v5610_v17 }
 0x286   : > { %v1961_v55 = vshrl.u32 %v1943_v49, %v1959_v24  ;;  %v1964_v40 = vadd.s32 127, %v1963_v53 }
 0x288   : > { %v1962_v10 = vor.u32 %v1961_v55, %v1960_v61  ;;  %v1965_v2 = vshll.u32 %v1964_v40, 23 }
 0x28a   : > { %v1966_v5 = vor.u32 4788187, %v1965_v2  ;;  %v1969_v8 = vcvt.s32.f32 %v1962_v10 }
 0x28b   : > { %v4107_v25 = vpop.eup %4106 }
 0x28c   : > { %v4109_v4 = vpop.eup %4108  ;;  %v1155_v43 = vxor.u32 2147483648, %v4107_v25  ;;  %v1967_v58 = vand.u32 2147483647, %v1966_v5 }
 0x28d   : > { %v1152_v41 = vxor.u32 2147483648, %v4109_v4 }
 0x28e   : > { %v1156_v36 = vsel %vm1154_vm5, %v1155_v43, %v4109_v4  ;;  %v2828_v18 = vsel %vm2826_vm2, %v1155_v43, %v4109_v4  ;;  %v1970_v30 = vmul.f32 %v1969_v8, %v1967_v58 }
 0x28f   : > { %v1153_v45 = vsel %vm1151_vm7, %v4107_v25, %v1152_v41  ;;  %v2825_v13 = vsel %vm2823_vm4, %v4107_v25, %v1152_v41 }
 0x290   : > { %v1157_v26 = vsel %vm1150_vm6, %v1153_v45, %v1156_v36  ;;  %v2829_v56 = vsel %vm2822_vm3, %v2825_v13, %v2828_v18  ;;  %v1971_v21 = vxor.u32 2147483648, %v1970_v30 }
 0x291   : > { %v1158_v31 = vsel %vm1147_vm8, nan, %v1157_v26  ;;  %v2830_v32 = vsel %vm1147_vm8, nan, %v2829_v56 }
 0x292   : > { %1998 = vst [vmem:[%s4623_s28 + $0x38] sm:$0xff] %v1158_v31  ;;  %3662 = vst [vmem:[%s4623_s28 + $0xb8] sm:$0xff] %v2830_v32  ;;  %v1972_v33 = vsel %vm1889_vm9, %v1971_v21, %v1970_v30 }
 0x293   : > { %v1975_v0 = vsel %vm1888_vm10, %v5610_v17, %v1972_v33 }
 0x294   : > { %4110 = vcosq.f32 %v1975_v0 }
 0x295   : > { %4112 = vsinq.f32 %v1975_v0 }
 0x2a1   : > { %v4111_v35 = vpop.eup %4110 }
 0x2a2   : > { %v4113_v60 = vpop.eup %4112  ;;  %v1987_v38 = vxor.u32 2147483648, %v4111_v35 }
 0x2a3   : > { %v1984_v3 = vxor.u32 2147483648, %v4113_v60 }
 0x2a4   : > { %v1988_v7 = vsel %vm1986_vm11, %v1987_v38, %v4113_v60  ;;  %v3652_v52 = vsel %vm3650_vm12, %v1987_v38, %v4113_v60 }
 0x2a5   : > { %v1985_v28 = vsel %vm1983_vm13, %v4111_v35, %v1984_v3  ;;  %v3649_v37 = vsel %vm3647_vm14, %v4111_v35, %v1984_v3 }
 0x2a6   : > { %v1989_v20 = vsel %vm1982_vm15, %v1985_v28, %v1988_v7  ;;  %v3653_v63 = vsel %vm3646_vm0, %v3649_v37, %v3652_v52 }
 0x2a7   : > { %v1990_v39 = vsel %vm1979_vm1, nan, %v1989_v20  ;;  %v3654_v47 = vsel %vm1979_vm1, nan, %v3653_v63 }
 0x2a8   : > { %2006 = vst [vmem:[%s4623_s28 + $0x78] sm:$0xff] %v1990_v39  ;;  %3670 = vst [vmem:[%s4623_s28 + $0xf8] sm:$0xff] %v3654_v47 }
 0x2a9   : > { %4127 = shalt.err (!%p4124_p5)
}
 0x2aa   : > { %s4128_s16 = scalar_lea.hbm %s5761_s12, 4096  ;;  %s4132_s23 = scalar_lea.hbm %s5817_s2, 8192 }
 0x2ab   : > { %p4129_p6 = scmp.ne.s32.totalorder %s5761_s12, %s4128_s16  ;;  %p4133_p10 = scmp.lt.s32.totalorder %s5761_s12, %s5817_s2 }
 0x2ac   : > { %p4134_p11 = scmp.lt.s32.totalorder %s4132_s23, %s4128_s16 }
 0x2ad   : > { %p4130_p7 = pnand %p4129_p6, %p4257_p4 }
 0x2ae   : > { %p4135_p12 = por %p4134_p11, %p4133_p10 }
 0x2af   : > { %p4131_p9 = pneg %p4130_p7 }
 0x2b1   : > { %p4136_p13 = pnand %p4135_p12, %p4131_p9 }
 0x2b3   : > { %4139 = shalt.err (!%p4136_p13)
}
 0x2b4   : > { %s4200_s26 = smov 256   ;;  %s4201_s27 = smov 16  }
 0x2b5   : > { %3985 = dma.vmem_to_hbm [thread:$0]  (%p4257_p4), %s5763_s30, 4096, %s5761_s12, %s5770_s5, %s4200_s26, %s4200_s26, %s4201_s27  }
 0x2b6 PF: > { %p3991_p0 = scmp.ge.s32.totalorder %s4190_s14, 2  ;;  %s3702_s28 = sand.u32 1, %s4170_s9  }
 0x2b7   : > { %s3703_s29 = scalar_lea.sflag [#allocation3], %s3702_s28 }
 0x2b8   : > { %p3988_p1 = pnand %p3991_p0, %p4264_p8 }
 0x2ba   : > { %p3989_p2 = pneg %p3988_p1 }
 0x2bc   : > { %4165 = dma.done.wait (%p3989_p2), %s3703_s29, 4096  }
 0x2bd   : > { %4167 = vsyncadd (%p3989_p2), %s3703_s29, 4294963200  ;;  %s15_s14 = sadd.s32 1, %s4190_s14   ;;  %s5846_s9 = smov %s4174_s10 }
 0x2be   : > { %p12_p3 = scmp.ge.s32.totalorder %s15_s14, 4   ;;  %s5847_s10 = smov %s4178_s11 }
 0x2bf   : > { %s5848_s11 = smov %s4270_s22  ;;  %s5849_s12 = smov %s4186_s13 }
 0x2c0   : > { %s5850_s13 = smov %s5852_s17  ;;  %14 = sbr.rel (!%p12_p3) target bundleno = 4 (0x4), region = 63 }
 0x2c5   :  { %3708 = vsyncpa [#allocation3], 1 }
 0x2c6   :  { %3710 = vsyncpa [#allocation3 + $0x1], 1 }

</bundles_post_ra>
